<compile_context>
chip_gen: v6e
topology: v6e:2x2x1
jax: 0.10.0
libtpu: 0.0.40
codegen_flags: <defaults>
</compile_context>

<pallas_src>
import numpy as np
import jax
import jax.numpy as jnp
from jax.experimental import pallas as pl
from jax.experimental.pallas import tpu as pltpu

# ----------------------------- configuration --------------------------------
VOCAB = 64
B = 2            # batch per view
S = 8            # sequence length
H = 32           # transformer hidden size
FFN = 4 * H      # feed-forward width
HIDDEN_MLP = 32  # projection head hidden width
OUT_DIM = 16     # projection head output dim
N_PROTO = 8      # number of prototypes
LANE = 128       # lane-dense padded output width
CLS_TOKEN_ID = 1
LN_EPS = 1e-12       # BERT-style LayerNorm eps inside the encoder
HEAD_LN_EPS = 1e-5   # torch.nn.LayerNorm default eps in projection head
NORM_EPS = 1e-12     # torch F.normalize eps

PARAM_ORDER = ["emb", "wqkv", "bqkv", "wo", "bo", "g1", "b1",
               "w1", "bf1", "w2", "bf2", "g2", "b2",
               "wh1", "bh1", "gh", "bh", "wh2", "bh2", "wp"]


def _ln(x, g, b, eps):
    mu = jnp.mean(x, axis=-1, keepdims=True)
    var = jnp.mean((x - mu) ** 2, axis=-1, keepdims=True)
    return (x - mu) * jax.lax.rsqrt(var + eps) * g + b


# ------------------------- fully fused forward kernel ------------------------
# TODO(synk): the real module runs a 12-layer multi-head pretrained HF encoder;
# this is a single-layer, single-head synthetic stand-in (no checkpoint load).
def fused_kernel(ids_ref, pos_ref, bias_ref, sel_ref, emb_ref,
                 wqkv_ref, bqkv_ref, wo_ref, bo_ref, g1_ref, b1_ref,
                 w1_ref, bf1_ref, w2_ref, bf2_ref, g2_ref, b2_ref,
                 wh1_ref, bh1_ref, gh_ref, bh_ref, wh2_ref, bh2_ref, wp_ref,
                 proj_ref, proto_ref):
    T = ids_ref.shape[0]

    # ---- embedding gather fused as one-hot matmul + positional add ----------
    ids = ids_ref[...]                                            # (T, 1) int32
    vocab_iota = jax.lax.broadcasted_iota(jnp.int32, (T, VOCAB), 1)
    onehot = (ids == vocab_iota).astype(jnp.float32)              # (T, VOCAB)
    x = jnp.dot(onehot, emb_ref[...],
                preferred_element_type=jnp.float32) + pos_ref[...]  # (T, H)

    # ---- self-attention (fused QKV; 1/sqrt(H) folded into Q at init) --------
    qkv = jnp.dot(x, wqkv_ref[...],
                  preferred_element_type=jnp.float32) + bqkv_ref[...]  # (T, 3H)
    q = qkv[:, 0:H]
    k = qkv[:, H:2 * H]
    v = qkv[:, 2 * H:3 * H]
    scores = jax.lax.dot_general(q, k, (((1,), (1,)), ((), ())),
                                 preferred_element_type=jnp.float32)   # (T, T)
    scores = scores + bias_ref[...]         # block-diagonal (per-sequence) mask
    m = jnp.max(scores, axis=-1, keepdims=True)
    p = jnp.exp(scores - m)
    p = p * pl.reciprocal(jnp.sum(p, axis=-1, keepdims=True), approx=True)
    ctx = jnp.dot(p, v, preferred_element_type=jnp.float32)
    attn_out = jnp.dot(ctx, wo_ref[...],
                       preferred_element_type=jnp.float32) + bo_ref[...]
    h1 = _ln(x + attn_out, g1_ref[...], b1_ref[...], LN_EPS)

    # ---- feed-forward --------------------------------------------------------
    ff = jnp.dot(h1, w1_ref[...], preferred_element_type=jnp.float32) + bf1_ref[...]
    # TODO(synk): torch.nn.GELU default is exact erf; tanh approximation used here.
    ff = jax.nn.gelu(ff, approximate=True)
    ff = jnp.dot(ff, w2_ref[...], preferred_element_type=jnp.float32) + bf2_ref[...]
    z = _ln(h1 + ff, g2_ref[...], b2_ref[...], LN_EPS)            # (T, H)

    # ---- CLS extraction / mean pooling fused as a selection matmul ----------
    pooled = jnp.dot(sel_ref[...], z,
                     preferred_element_type=jnp.float32)          # (N_pad, H)

    # ---- projection head: Linear -> LayerNorm -> ReLU -> Linear (lane-padded)
    h = jnp.dot(pooled, wh1_ref[...],
                preferred_element_type=jnp.float32) + bh1_ref[...]
    h = _ln(h, gh_ref[...], bh_ref[...], HEAD_LN_EPS)
    h = jnp.maximum(h, 0.0)
    zp = jnp.dot(h, wh2_ref[...],
                 preferred_element_type=jnp.float32) + bh2_ref[...]  # (N_pad, 128)
    # F.normalize(x, dim=1, p=2): padded lanes are exactly zero -> norm unaffected
    norm = jnp.sqrt(jnp.sum(zp * zp, axis=-1, keepdims=True))
    zn = zp * pl.reciprocal(jnp.maximum(norm, NORM_EPS))
    proj_ref[...] = zn                                            # unmasked store
    proto_ref[...] = jnp.dot(zn, wp_ref[...],
                             preferred_element_type=jnp.float32)  # unmasked store


def _full_spec(shape):
    n = len(shape)
    return pl.BlockSpec(shape, lambda i, _n=n: (0,) * _n)


def fused_forward(ids, pos_flat, attn_bias, sel, params):
    n_pad = sel.shape[0]
    flat = [params[k] for k in PARAM_ORDER]
    args = [ids, pos_flat, attn_bias, sel] + flat
    return pl.pallas_call(
        fused_kernel,
        out_shape=(jax.ShapeDtypeStruct((n_pad, LANE), jnp.float32),
                   jax.ShapeDtypeStruct((n_pad, LANE), jnp.float32)),
        grid=(1,),
        in_specs=[_full_spec(a.shape) for a in args],
        out_specs=(_full_spec((n_pad, LANE)), _full_spec((n_pad, LANE))),
        compiler_params=pltpu.CompilerParams(
            dimension_semantics=("arbitrary",)),
    )(*args)


# ----------------------------- host-side glue --------------------------------
def build_selection(cls_indices, n_views, batch, seq_len, cls):
    """Selection matrix implementing _extract_columns (cls=True) or mean pooling."""
    T = n_views * batch * seq_len
    rows = []
    if cls:
        for j in range(n_views):
            for rid in range(len(cls_indices[j])):
                for i in cls_indices[j][rid]:
                    r = np.zeros((T,), np.float32)
                    r[j * batch * seq_len + rid * seq_len + i] = 1.0
                    rows.append(r)
    else:
        for j in range(n_views):
            for b in range(batch):
                r = np.zeros((T,), np.float32)
                base = (j * batch + b) * seq_len
                r[base:base + seq_len] = 1.0 / seq_len
                rows.append(r)
    n = len(rows)
    n_pad = ((n + 7) // 8) * 8
    sel = np.zeros((n_pad, T), np.float32)
    sel[:n] = np.stack(rows)
    return jnp.asarray(sel), n


def build_attn_bias(n_rows, seq_len):
    # TODO(synk): no padding-token mask — only block-diagonal per-sequence masking.
    T = n_rows * seq_len
    seg = np.arange(T) // seq_len
    bias = np.where(seg[:, None] == seg[None, :], 0.0, -1e30).astype(np.float32)
    return jnp.asarray(bias)


# ----------------------------- parameters ------------------------------------
def init_params(key):
    ks = jax.random.split(key, 12)
    scale = 0.02

    def nrm(k, shape):
        return jax.random.normal(k, shape, jnp.float32) * scale

    attn_scale = 1.0 / float(np.sqrt(H))
    wq = nrm(ks[2], (H, H)) * attn_scale          # 1/sqrt(H) folded into Q proj
    wk = nrm(ks[3], (H, H))
    wv = nrm(ks[4], (H, H))
    wqkv = jnp.concatenate([wq, wk, wv], axis=1)  # (H, 3H) fused QKV weight
    bqkv = jnp.zeros((1, 3 * H), jnp.float32)

    wh2 = nrm(ks[9], (HIDDEN_MLP, OUT_DIM))
    wh2_pad = jnp.zeros((HIDDEN_MLP, LANE), jnp.float32).at[:, :OUT_DIM].set(wh2)
    bh2_pad = jnp.zeros((1, LANE), jnp.float32)
    wp = nrm(ks[10], (OUT_DIM, N_PROTO))          # prototypes W^T
    wp_pad = jnp.zeros((LANE, LANE), jnp.float32).at[:OUT_DIM, :N_PROTO].set(wp)

    return {
        "emb": nrm(ks[0], (VOCAB, H)),
        "pos": nrm(ks[1], (S, H)),
        "wqkv": wqkv, "bqkv": bqkv,
        "wo": nrm(ks[5], (H, H)), "bo": jnp.zeros((1, H), jnp.float32),
        "g1": jnp.ones((1, H), jnp.float32), "b1": jnp.zeros((1, H), jnp.float32),
        "w1": nrm(ks[6], (H, FFN)), "bf1": jnp.zeros((1, FFN), jnp.float32),
        "w2": nrm(ks[7], (FFN, H)), "bf2": jnp.zeros((1, H), jnp.float32),
        "g2": jnp.ones((1, H), jnp.float32), "b2": jnp.zeros((1, H), jnp.float32),
        "wh1": nrm(ks[8], (H, HIDDEN_MLP)),
        "bh1": jnp.zeros((1, HIDDEN_MLP), jnp.float32),
        "gh": jnp.ones((1, HIDDEN_MLP), jnp.float32),
        "bh": jnp.zeros((1, HIDDEN_MLP), jnp.float32),
        "wh2": wh2_pad, "bh2": bh2_pad,
        "wp": wp_pad,
    }


# ----------------------------- full forward ----------------------------------
def transformer_model_forward(inputs, params, cls=True):
    """Mirrors TransformerModel.forward: inputs = [x_view0, x_view1, ..., cls_indices]."""
    x_vals = inputs[:-1]
    cls_indices = inputs[-1]
    n_views = len(x_vals)
    batch, seq_len = x_vals[0].shape

    # fuse all views into a single kernel call (stacked on the batch axis)
    x_all = jnp.concatenate([x.astype(jnp.int32) for x in x_vals], axis=0)
    total = n_views * batch
    T = total * seq_len
    ids = x_all.reshape(T, 1)
    pos_flat = jnp.tile(params["pos"], (total, 1))                 # (T, H)
    attn_bias = build_attn_bias(total, seq_len)
    sel, n_rows = build_selection(cls_indices, n_views, batch, seq_len, cls)

    proj_pad, proto_pad = fused_forward(ids, pos_flat, attn_bias, sel, params)
    return proj_pad[:n_rows, :OUT_DIM], proto_pad[:n_rows, :N_PROTO]


# --------------------------------- main ---------------------------------------
if __name__ == "__main__":
    key = jax.random.PRNGKey(0)
    pkey, dkey0, dkey1 = jax.random.split(key, 3)
    params = init_params(pkey)

    # Two augmented views of token ids; position 0 holds the CLS token.
    x0 = jax.random.randint(dkey0, (B, S), 2, VOCAB, dtype=jnp.int32)
    x1 = jax.random.randint(dkey1, (B, S), 2, VOCAB, dtype=jnp.int32)
    x0 = x0.at[:, 0].set(CLS_TOKEN_ID)
    x1 = x1.at[:, 0].set(CLS_TOKEN_ID)
    cls_indices = [[[0], [0]], [[0], [0]]]   # one CLS per row, per view

    inputs = [x0, x1, cls_indices]
    proj, proto = transformer_model_forward(inputs, params, cls=True)
    jax.block_until_ready(proj)
    jax.block_until_ready(proto)

    assert proj.shape == (2 * B, OUT_DIM)
    assert proto.shape == (2 * B, N_PROTO)
    # L2-normalized rows should have unit norm.
    assert bool(jnp.allclose(jnp.linalg.norm(proj, axis=1), 1.0, atol=1e-3))
    print("KERNEL_OK")
</pallas_src>

<mosaic_0001>
module attributes {stable_mosaic.version = 11 : i64} {
  func.func @fused_kernel(%arg0: i32, %arg1: memref<32x1xi32, #tpu.memory_space<vmem>>, %arg2: memref<32x32xf32, #tpu.memory_space<vmem>>, %arg3: memref<32x32xf32, #tpu.memory_space<vmem>>, %arg4: memref<8x32xf32, #tpu.memory_space<vmem>>, %arg5: memref<64x32xf32, #tpu.memory_space<vmem>>, %arg6: memref<32x96xf32, #tpu.memory_space<vmem>>, %arg7: memref<1x96xf32, #tpu.memory_space<vmem>>, %arg8: memref<32x32xf32, #tpu.memory_space<vmem>>, %arg9: memref<1x32xf32, #tpu.memory_space<vmem>>, %arg10: memref<1x32xf32, #tpu.memory_space<vmem>>, %arg11: memref<1x32xf32, #tpu.memory_space<vmem>>, %arg12: memref<32x128xf32, #tpu.memory_space<vmem>>, %arg13: memref<1x128xf32, #tpu.memory_space<vmem>>, %arg14: memref<128x32xf32, #tpu.memory_space<vmem>>, %arg15: memref<1x32xf32, #tpu.memory_space<vmem>>, %arg16: memref<1x32xf32, #tpu.memory_space<vmem>>, %arg17: memref<1x32xf32, #tpu.memory_space<vmem>>, %arg18: memref<32x32xf32, #tpu.memory_space<vmem>>, %arg19: memref<1x32xf32, #tpu.memory_space<vmem>>, %arg20: memref<1x32xf32, #tpu.memory_space<vmem>>, %arg21: memref<1x32xf32, #tpu.memory_space<vmem>>, %arg22: memref<32x128xf32, #tpu.memory_space<vmem>>, %arg23: memref<1x128xf32, #tpu.memory_space<vmem>>, %arg24: memref<128x128xf32, #tpu.memory_space<vmem>>, %arg25: memref<8x128xf32, #tpu.memory_space<vmem>>, %arg26: memref<8x128xf32, #tpu.memory_space<vmem>>) attributes {dimension_semantics = [#tpu.dimension_semantics<arbitrary>], iteration_bounds = array<i64: 1>, scalar_prefetch = 0 : i64, scratch_operands = 0 : i64, tpu.core_type = #tpu.core_type<tc>, window_params = [{pipeline_mode = #tpu.pipeline_mode<synchronous>, transform_indices = @transform_0, window_bounds = array<i64: 32, 1>}, {pipeline_mode = #tpu.pipeline_mode<synchronous>, transform_indices = @transform_1, window_bounds = array<i64: 32, 32>}, {pipeline_mode = #tpu.pipeline_mode<synchronous>, transform_indices = @transform_2, window_bounds = array<i64: 32, 32>}, {pipeline_mode = #tpu.pipeline_mode<synchronous>, transform_indices = @transform_3, window_bounds = array<i64: 8, 32>}, {pipeline_mode = #tpu.pipeline_mode<synchronous>, transform_indices = @transform_4, window_bounds = array<i64: 64, 32>}, {pipeline_mode = #tpu.pipeline_mode<synchronous>, transform_indices = @transform_5, window_bounds = array<i64: 32, 96>}, {pipeline_mode = #tpu.pipeline_mode<synchronous>, transform_indices = @transform_6, window_bounds = array<i64: 1, 96>}, {pipeline_mode = #tpu.pipeline_mode<synchronous>, transform_indices = @transform_7, window_bounds = array<i64: 32, 32>}, {pipeline_mode = #tpu.pipeline_mode<synchronous>, transform_indices = @transform_8, window_bounds = array<i64: 1, 32>}, {pipeline_mode = #tpu.pipeline_mode<synchronous>, transform_indices = @transform_9, window_bounds = array<i64: 1, 32>}, {pipeline_mode = #tpu.pipeline_mode<synchronous>, transform_indices = @transform_10, window_bounds = array<i64: 1, 32>}, {pipeline_mode = #tpu.pipeline_mode<synchronous>, transform_indices = @transform_11, window_bounds = array<i64: 32, 128>}, {pipeline_mode = #tpu.pipeline_mode<synchronous>, transform_indices = @transform_12, window_bounds = array<i64: 1, 128>}, {pipeline_mode = #tpu.pipeline_mode<synchronous>, transform_indices = @transform_13, window_bounds = array<i64: 128, 32>}, {pipeline_mode = #tpu.pipeline_mode<synchronous>, transform_indices = @transform_14, window_bounds = array<i64: 1, 32>}, {pipeline_mode = #tpu.pipeline_mode<synchronous>, transform_indices = @transform_15, window_bounds = array<i64: 1, 32>}, {pipeline_mode = #tpu.pipeline_mode<synchronous>, transform_indices = @transform_16, window_bounds = array<i64: 1, 32>}, {pipeline_mode = #tpu.pipeline_mode<synchronous>, transform_indices = @transform_17, window_bounds = array<i64: 32, 32>}, {pipeline_mode = #tpu.pipeline_mode<synchronous>, transform_indices = @transform_18, window_bounds = array<i64: 1, 32>}, {pipeline_mode = #tpu.pipeline_mode<synchronous>, transform_indices = @transform_19, window_bounds = array<i64: 1, 32>}, {pipeline_mode = #tpu.pipeline_mode<synchronous>, transform_indices = @transform_20, window_bounds = array<i64: 1, 32>}, {pipeline_mode = #tpu.pipeline_mode<synchronous>, transform_indices = @transform_21, window_bounds = array<i64: 32, 128>}, {pipeline_mode = #tpu.pipeline_mode<synchronous>, transform_indices = @transform_22, window_bounds = array<i64: 1, 128>}, {pipeline_mode = #tpu.pipeline_mode<synchronous>, transform_indices = @transform_23, window_bounds = array<i64: 128, 128>}, {pipeline_mode = #tpu.pipeline_mode<synchronous>, transform_indices = @transform_24, window_bounds = array<i64: 8, 128>}, {pipeline_mode = #tpu.pipeline_mode<synchronous>, transform_indices = @transform_25, window_bounds = array<i64: 8, 128>}]} {
    %c0 = arith.constant 0 : index
    %c0_0 = arith.constant 0 : index
    %0 = vector.load %arg1[%c0, %c0_0] : memref<32x1xi32, #tpu.memory_space<vmem>>, vector<32x1xi32>
    %1 = tpu.iota {dimensions = array<i32: 1>} : vector<32x64xi32>
    %2 = vector.broadcast %0 : vector<32x1xi32> to vector<32x64xi32>
    %3 = arith.cmpi eq, %2, %1 : vector<32x64xi32>
    %4 = arith.extui %3 : vector<32x64xi1> to vector<32x64xi32>
    %5 = arith.sitofp %4 : vector<32x64xi32> to vector<32x64xf32>
    %c0_1 = arith.constant 0 : index
    %c0_2 = arith.constant 0 : index
    %6 = vector.load %arg5[%c0_1, %c0_2] : memref<64x32xf32, #tpu.memory_space<vmem>>, vector<64x32xf32>
    %cst = arith.constant dense<0.000000e+00> : vector<32x32xf32>
    %7 = tpu.matmul %5, %6, %cst {dimension_numbers = #tpu.dot_dimension_numbers<[1], [0], [0], [1], [0, 0, 1, 1], [], []>} : vector<32x64xf32>, vector<64x32xf32>, vector<32x32xf32> -> vector<32x32xf32>
    %c0_3 = arith.constant 0 : index
    %c0_4 = arith.constant 0 : index
    %8 = vector.load %arg2[%c0_3, %c0_4] : memref<32x32xf32, #tpu.memory_space<vmem>>, vector<32x32xf32>
    %9 = arith.addf %7, %8 : vector<32x32xf32>
    %c0_5 = arith.constant 0 : index
    %c0_6 = arith.constant 0 : index
    %10 = vector.load %arg6[%c0_5, %c0_6] : memref<32x96xf32, #tpu.memory_space<vmem>>, vector<32x96xf32>
    %cst_7 = arith.constant dense<0.000000e+00> : vector<32x96xf32>
    %11 = tpu.matmul %9, %10, %cst_7 {dimension_numbers = #tpu.dot_dimension_numbers<[1], [0], [0], [1], [0, 0, 1, 1], [], []>} : vector<32x32xf32>, vector<32x96xf32>, vector<32x96xf32> -> vector<32x96xf32>
    %c0_8 = arith.constant 0 : index
    %c0_9 = arith.constant 0 : index
    %12 = vector.load %arg7[%c0_8, %c0_9] : memref<1x96xf32, #tpu.memory_space<vmem>>, vector<1x96xf32>
    %13 = vector.broadcast %12 : vector<1x96xf32> to vector<32x96xf32>
    %14 = arith.addf %11, %13 : vector<32x96xf32>
    %15 = vector.extract_strided_slice %14 {offsets = [0, 0], sizes = [32, 32], strides = [1, 1]} : vector<32x96xf32> to vector<32x32xf32>
    %16 = vector.extract_strided_slice %14 {offsets = [0, 32], sizes = [32, 32], strides = [1, 1]} : vector<32x96xf32> to vector<32x32xf32>
    %17 = vector.extract_strided_slice %14 {offsets = [0, 64], sizes = [32, 32], strides = [1, 1]} : vector<32x96xf32> to vector<32x32xf32>
    %cst_10 = arith.constant dense<0.000000e+00> : vector<32x32xf32>
    %18 = tpu.matmul %15, %16, %cst_10 {dimension_numbers = #tpu.dot_dimension_numbers<[1], [1], [0], [0], [0, 0, 1, 0], [], []>} : vector<32x32xf32>, vector<32x32xf32>, vector<32x32xf32> -> vector<32x32xf32>
    %c0_11 = arith.constant 0 : index
    %c0_12 = arith.constant 0 : index
    %19 = vector.load %arg3[%c0_11, %c0_12] : memref<32x32xf32, #tpu.memory_space<vmem>>, vector<32x32xf32>
    %20 = arith.addf %18, %19 : vector<32x32xf32>
    %cst_13 = arith.constant dense<0xFF800000> : vector<32xf32>
    %21 = vector.multi_reduction <maximumf>, %20, %cst_13 [1] : vector<32x32xf32> to vector<32xf32>
    %22 = vector.shape_cast %21 : vector<32xf32> to vector<32x1xf32>
    %23 = vector.broadcast %22 : vector<32x1xf32> to vector<32x32xf32>
    %24 = arith.subf %20, %23 : vector<32x32xf32>
    %25 = math.exp %24 : vector<32x32xf32>
    %cst_14 = arith.constant dense<0.000000e+00> : vector<32xf32>
    %26 = vector.multi_reduction <add>, %25, %cst_14 [1] : vector<32x32xf32> to vector<32xf32>
    %27 = vector.shape_cast %26 : vector<32xf32> to vector<32x1xf32>
    %28 = tpu.reciprocal %27 {approx = true} : vector<32x1xf32> -> vector<32x1xf32>
    %29 = vector.broadcast %28 : vector<32x1xf32> to vector<32x32xf32>
    %30 = arith.mulf %25, %29 : vector<32x32xf32>
    %cst_15 = arith.constant dense<0.000000e+00> : vector<32x32xf32>
    %31 = tpu.matmul %30, %17, %cst_15 {dimension_numbers = #tpu.dot_dimension_numbers<[1], [0], [0], [1], [0, 0, 1, 1], [], []>} : vector<32x32xf32>, vector<32x32xf32>, vector<32x32xf32> -> vector<32x32xf32>
    %c0_16 = arith.constant 0 : index
    %c0_17 = arith.constant 0 : index
    %32 = vector.load %arg8[%c0_16, %c0_17] : memref<32x32xf32, #tpu.memory_space<vmem>>, vector<32x32xf32>
    %cst_18 = arith.constant dense<0.000000e+00> : vector<32x32xf32>
    %33 = tpu.matmul %31, %32, %cst_18 {dimension_numbers = #tpu.dot_dimension_numbers<[1], [0], [0], [1], [0, 0, 1, 1], [], []>} : vector<32x32xf32>, vector<32x32xf32>, vector<32x32xf32> -> vector<32x32xf32>
    %c0_19 = arith.constant 0 : index
    %c0_20 = arith.constant 0 : index
    %34 = vector.load %arg9[%c0_19, %c0_20] : memref<1x32xf32, #tpu.memory_space<vmem>>, vector<1x32xf32>
    %35 = vector.broadcast %34 : vector<1x32xf32> to vector<32x32xf32>
    %36 = arith.addf %33, %35 : vector<32x32xf32>
    %37 = arith.addf %9, %36 : vector<32x32xf32>
    %c0_21 = arith.constant 0 : index
    %c0_22 = arith.constant 0 : index
    %38 = vector.load %arg10[%c0_21, %c0_22] : memref<1x32xf32, #tpu.memory_space<vmem>>, vector<1x32xf32>
    %c0_23 = arith.constant 0 : index
    %c0_24 = arith.constant 0 : index
    %39 = vector.load %arg11[%c0_23, %c0_24] : memref<1x32xf32, #tpu.memory_space<vmem>>, vector<1x32xf32>
    %cst_25 = arith.constant dense<0.000000e+00> : vector<32xf32>
    %40 = vector.multi_reduction <add>, %37, %cst_25 [1] : vector<32x32xf32> to vector<32xf32>
    %41 = vector.shape_cast %40 : vector<32xf32> to vector<32x1xf32>
    %cst_26 = arith.constant 3.200000e+01 : f32
    %42 = vector.broadcast %cst_26 : f32 to vector<32x1xf32>
    %43 = arith.divf %41, %42 : vector<32x1xf32>
    %44 = vector.broadcast %43 : vector<32x1xf32> to vector<32x32xf32>
    %45 = arith.subf %37, %44 : vector<32x32xf32>
    %46 = arith.mulf %45, %45 : vector<32x32xf32>
    %cst_27 = arith.constant dense<0.000000e+00> : vector<32xf32>
    %47 = vector.multi_reduction <add>, %46, %cst_27 [1] : vector<32x32xf32> to vector<32xf32>
    %48 = vector.shape_cast %47 : vector<32xf32> to vector<32x1xf32>
    %cst_28 = arith.constant 3.200000e+01 : f32
    %49 = vector.broadcast %cst_28 : f32 to vector<32x1xf32>
    %50 = arith.divf %48, %49 : vector<32x1xf32>
    %51 = vector.broadcast %43 : vector<32x1xf32> to vector<32x32xf32>
    %52 = arith.subf %37, %51 : vector<32x32xf32>
    %cst_29 = arith.constant 9.99999996E-13 : f32
    %53 = vector.broadcast %cst_29 : f32 to vector<32x1xf32>
    %54 = arith.addf %50, %53 : vector<32x1xf32>
    %55 = math.rsqrt %54 : vector<32x1xf32>
    %56 = vector.broadcast %55 : vector<32x1xf32> to vector<32x32xf32>
    %57 = arith.mulf %52, %56 : vector<32x32xf32>
    %58 = vector.broadcast %38 : vector<1x32xf32> to vector<32x32xf32>
    %59 = arith.mulf %57, %58 : vector<32x32xf32>
    %60 = vector.broadcast %39 : vector<1x32xf32> to vector<32x32xf32>
    %61 = arith.addf %59, %60 : vector<32x32xf32>
    %c0_30 = arith.constant 0 : index
    %c0_31 = arith.constant 0 : index
    %62 = vector.load %arg12[%c0_30, %c0_31] : memref<32x128xf32, #tpu.memory_space<vmem>>, vector<32x128xf32>
    %cst_32 = arith.constant dense<0.000000e+00> : vector<32x128xf32>
    %63 = tpu.matmul %61, %62, %cst_32 {dimension_numbers = #tpu.dot_dimension_numbers<[1], [0], [0], [1], [0, 0, 1, 1], [], []>} : vector<32x32xf32>, vector<32x128xf32>, vector<32x128xf32> -> vector<32x128xf32>
    %c0_33 = arith.constant 0 : index
    %c0_34 = arith.constant 0 : index
    %64 = vector.load %arg13[%c0_33, %c0_34] : memref<1x128xf32, #tpu.memory_space<vmem>>, vector<1x128xf32>
    %65 = vector.broadcast %64 : vector<1x128xf32> to vector<32x128xf32>
    %66 = arith.addf %63, %65 : vector<32x128xf32>
    %67 = arith.mulf %66, %66 : vector<32x128xf32>
    %68 = arith.mulf %66, %67 : vector<32x128xf32>
    %cst_35 = arith.constant 4.471500e-02 : f32
    %69 = vector.broadcast %cst_35 : f32 to vector<32x128xf32>
    %70 = arith.mulf %69, %68 : vector<32x128xf32>
    %71 = arith.addf %66, %70 : vector<32x128xf32>
    %cst_36 = arith.constant 0.797884583 : f32
    %72 = vector.broadcast %cst_36 : f32 to vector<32x128xf32>
    %73 = arith.mulf %72, %71 : vector<32x128xf32>
    %74 = math.tanh %73 : vector<32x128xf32>
    %cst_37 = arith.constant 1.000000e+00 : f32
    %75 = vector.broadcast %cst_37 : f32 to vector<32x128xf32>
    %76 = arith.addf %75, %74 : vector<32x128xf32>
    %cst_38 = arith.constant 5.000000e-01 : f32
    %77 = vector.broadcast %cst_38 : f32 to vector<32x128xf32>
    %78 = arith.mulf %77, %76 : vector<32x128xf32>
    %79 = arith.mulf %66, %78 : vector<32x128xf32>
    %c0_39 = arith.constant 0 : index
    %c0_40 = arith.constant 0 : index
    %80 = vector.load %arg14[%c0_39, %c0_40] : memref<128x32xf32, #tpu.memory_space<vmem>>, vector<128x32xf32>
    %cst_41 = arith.constant dense<0.000000e+00> : vector<32x32xf32>
    %81 = tpu.matmul %79, %80, %cst_41 {dimension_numbers = #tpu.dot_dimension_numbers<[1], [0], [0], [1], [0, 0, 1, 1], [], []>} : vector<32x128xf32>, vector<128x32xf32>, vector<32x32xf32> -> vector<32x32xf32>
    %c0_42 = arith.constant 0 : index
    %c0_43 = arith.constant 0 : index
    %82 = vector.load %arg15[%c0_42, %c0_43] : memref<1x32xf32, #tpu.memory_space<vmem>>, vector<1x32xf32>
    %83 = vector.broadcast %82 : vector<1x32xf32> to vector<32x32xf32>
    %84 = arith.addf %81, %83 : vector<32x32xf32>
    %85 = arith.addf %61, %84 : vector<32x32xf32>
    %c0_44 = arith.constant 0 : index
    %c0_45 = arith.constant 0 : index
    %86 = vector.load %arg16[%c0_44, %c0_45] : memref<1x32xf32, #tpu.memory_space<vmem>>, vector<1x32xf32>
    %c0_46 = arith.constant 0 : index
    %c0_47 = arith.constant 0 : index
    %87 = vector.load %arg17[%c0_46, %c0_47] : memref<1x32xf32, #tpu.memory_space<vmem>>, vector<1x32xf32>
    %cst_48 = arith.constant dense<0.000000e+00> : vector<32xf32>
    %88 = vector.multi_reduction <add>, %85, %cst_48 [1] : vector<32x32xf32> to vector<32xf32>
    %89 = vector.shape_cast %88 : vector<32xf32> to vector<32x1xf32>
    %cst_49 = arith.constant 3.200000e+01 : f32
    %90 = vector.broadcast %cst_49 : f32 to vector<32x1xf32>
    %91 = arith.divf %89, %90 : vector<32x1xf32>
    %92 = vector.broadcast %91 : vector<32x1xf32> to vector<32x32xf32>
    %93 = arith.subf %85, %92 : vector<32x32xf32>
    %94 = arith.mulf %93, %93 : vector<32x32xf32>
    %cst_50 = arith.constant dense<0.000000e+00> : vector<32xf32>
    %95 = vector.multi_reduction <add>, %94, %cst_50 [1] : vector<32x32xf32> to vector<32xf32>
    %96 = vector.shape_cast %95 : vector<32xf32> to vector<32x1xf32>
    %cst_51 = arith.constant 3.200000e+01 : f32
    %97 = vector.broadcast %cst_51 : f32 to vector<32x1xf32>
    %98 = arith.divf %96, %97 : vector<32x1xf32>
    %99 = vector.broadcast %91 : vector<32x1xf32> to vector<32x32xf32>
    %100 = arith.subf %85, %99 : vector<32x32xf32>
    %cst_52 = arith.constant 9.99999996E-13 : f32
    %101 = vector.broadcast %cst_52 : f32 to vector<32x1xf32>
    %102 = arith.addf %98, %101 : vector<32x1xf32>
    %103 = math.rsqrt %102 : vector<32x1xf32>
    %104 = vector.broadcast %103 : vector<32x1xf32> to vector<32x32xf32>
    %105 = arith.mulf %100, %104 : vector<32x32xf32>
    %106 = vector.broadcast %86 : vector<1x32xf32> to vector<32x32xf32>
    %107 = arith.mulf %105, %106 : vector<32x32xf32>
    %108 = vector.broadcast %87 : vector<1x32xf32> to vector<32x32xf32>
    %109 = arith.addf %107, %108 : vector<32x32xf32>
    %c0_53 = arith.constant 0 : index
    %c0_54 = arith.constant 0 : index
    %110 = vector.load %arg4[%c0_53, %c0_54] : memref<8x32xf32, #tpu.memory_space<vmem>>, vector<8x32xf32>
    %cst_55 = arith.constant dense<0.000000e+00> : vector<8x32xf32>
    %111 = tpu.matmul %110, %109, %cst_55 {dimension_numbers = #tpu.dot_dimension_numbers<[1], [0], [0], [1], [0, 0, 1, 1], [], []>} : vector<8x32xf32>, vector<32x32xf32>, vector<8x32xf32> -> vector<8x32xf32>
    %c0_56 = arith.constant 0 : index
    %c0_57 = arith.constant 0 : index
    %112 = vector.load %arg18[%c0_56, %c0_57] : memref<32x32xf32, #tpu.memory_space<vmem>>, vector<32x32xf32>
    %cst_58 = arith.constant dense<0.000000e+00> : vector<8x32xf32>
    %113 = tpu.matmul %111, %112, %cst_58 {dimension_numbers = #tpu.dot_dimension_numbers<[1], [0], [0], [1], [0, 0, 1, 1], [], []>} : vector<8x32xf32>, vector<32x32xf32>, vector<8x32xf32> -> vector<8x32xf32>
    %c0_59 = arith.constant 0 : index
    %c0_60 = arith.constant 0 : index
    %114 = vector.load %arg19[%c0_59, %c0_60] : memref<1x32xf32, #tpu.memory_space<vmem>>, vector<1x32xf32>
    %115 = vector.broadcast %114 : vector<1x32xf32> to vector<8x32xf32>
    %116 = arith.addf %113, %115 : vector<8x32xf32>
    %c0_61 = arith.constant 0 : index
    %c0_62 = arith.constant 0 : index
    %117 = vector.load %arg20[%c0_61, %c0_62] : memref<1x32xf32, #tpu.memory_space<vmem>>, vector<1x32xf32>
    %c0_63 = arith.constant 0 : index
    %c0_64 = arith.constant 0 : index
    %118 = vector.load %arg21[%c0_63, %c0_64] : memref<1x32xf32, #tpu.memory_space<vmem>>, vector<1x32xf32>
    %cst_65 = arith.constant dense<0.000000e+00> : vector<8xf32>
    %119 = vector.multi_reduction <add>, %116, %cst_65 [1] : vector<8x32xf32> to vector<8xf32>
    %120 = vector.shape_cast %119 : vector<8xf32> to vector<8x1xf32>
    %cst_66 = arith.constant 3.200000e+01 : f32
    %121 = vector.broadcast %cst_66 : f32 to vector<8x1xf32>
    %122 = arith.divf %120, %121 : vector<8x1xf32>
    %123 = vector.broadcast %122 : vector<8x1xf32> to vector<8x32xf32>
    %124 = arith.subf %116, %123 : vector<8x32xf32>
    %125 = arith.mulf %124, %124 : vector<8x32xf32>
    %cst_67 = arith.constant dense<0.000000e+00> : vector<8xf32>
    %126 = vector.multi_reduction <add>, %125, %cst_67 [1] : vector<8x32xf32> to vector<8xf32>
    %127 = vector.shape_cast %126 : vector<8xf32> to vector<8x1xf32>
    %cst_68 = arith.constant 3.200000e+01 : f32
    %128 = vector.broadcast %cst_68 : f32 to vector<8x1xf32>
    %129 = arith.divf %127, %128 : vector<8x1xf32>
    %130 = vector.broadcast %122 : vector<8x1xf32> to vector<8x32xf32>
    %131 = arith.subf %116, %130 : vector<8x32xf32>
    %cst_69 = arith.constant 9.99999974E-6 : f32
    %132 = vector.broadcast %cst_69 : f32 to vector<8x1xf32>
    %133 = arith.addf %129, %132 : vector<8x1xf32>
    %134 = math.rsqrt %133 : vector<8x1xf32>
    %135 = vector.broadcast %134 : vector<8x1xf32> to vector<8x32xf32>
    %136 = arith.mulf %131, %135 : vector<8x32xf32>
    %137 = vector.broadcast %117 : vector<1x32xf32> to vector<8x32xf32>
    %138 = arith.mulf %136, %137 : vector<8x32xf32>
    %139 = vector.broadcast %118 : vector<1x32xf32> to vector<8x32xf32>
    %140 = arith.addf %138, %139 : vector<8x32xf32>
    %cst_70 = arith.constant 0.000000e+00 : f32
    %141 = vector.broadcast %cst_70 : f32 to vector<8x32xf32>
    %142 = arith.maximumf %140, %141 : vector<8x32xf32>
    %c0_71 = arith.constant 0 : index
    %c0_72 = arith.constant 0 : index
    %143 = vector.load %arg22[%c0_71, %c0_72] : memref<32x128xf32, #tpu.memory_space<vmem>>, vector<32x128xf32>
    %cst_73 = arith.constant dense<0.000000e+00> : vector<8x128xf32>
    %144 = tpu.matmul %142, %143, %cst_73 {dimension_numbers = #tpu.dot_dimension_numbers<[1], [0], [0], [1], [0, 0, 1, 1], [], []>} : vector<8x32xf32>, vector<32x128xf32>, vector<8x128xf32> -> vector<8x128xf32>
    %c0_74 = arith.constant 0 : index
    %c0_75 = arith.constant 0 : index
    %145 = vector.load %arg23[%c0_74, %c0_75] : memref<1x128xf32, #tpu.memory_space<vmem>>, vector<1x128xf32>
    %146 = vector.broadcast %145 : vector<1x128xf32> to vector<8x128xf32>
    %147 = arith.addf %144, %146 : vector<8x128xf32>
    %148 = arith.mulf %147, %147 : vector<8x128xf32>
    %cst_76 = arith.constant dense<0.000000e+00> : vector<8xf32>
    %149 = vector.multi_reduction <add>, %148, %cst_76 [1] : vector<8x128xf32> to vector<8xf32>
    %150 = vector.shape_cast %149 : vector<8xf32> to vector<8x1xf32>
    %151 = math.sqrt %150 : vector<8x1xf32>
    %cst_77 = arith.constant 9.99999996E-13 : f32
    %152 = vector.broadcast %cst_77 : f32 to vector<8x1xf32>
    %153 = arith.maximumf %151, %152 : vector<8x1xf32>
    %154 = tpu.reciprocal %153 : vector<8x1xf32> -> vector<8x1xf32>
    %155 = vector.broadcast %154 : vector<8x1xf32> to vector<8x128xf32>
    %156 = arith.mulf %147, %155 : vector<8x128xf32>
    %c0_78 = arith.constant 0 : index
    %c0_79 = arith.constant 0 : index
    %157 = vector.load %arg25[%c0_78, %c0_79] : memref<8x128xf32, #tpu.memory_space<vmem>>, vector<8x128xf32>
    tpu.vector_store %arg25[%c0_78, %c0_79], %156 {strides = array<i32>} : memref<8x128xf32, #tpu.memory_space<vmem>>, vector<8x128xf32>,
    %c0_80 = arith.constant 0 : index
    %c0_81 = arith.constant 0 : index
    %158 = vector.load %arg24[%c0_80, %c0_81] : memref<128x128xf32, #tpu.memory_space<vmem>>, vector<128x128xf32>
    %cst_82 = arith.constant dense<0.000000e+00> : vector<8x128xf32>
    %159 = tpu.matmul %156, %158, %cst_82 {dimension_numbers = #tpu.dot_dimension_numbers<[1], [0], [0], [1], [0, 0, 1, 1], [], []>} : vector<8x128xf32>, vector<128x128xf32>, vector<8x128xf32> -> vector<8x128xf32>
    %c0_83 = arith.constant 0 : index
    %c0_84 = arith.constant 0 : index
    %160 = vector.load %arg26[%c0_83, %c0_84] : memref<8x128xf32, #tpu.memory_space<vmem>>, vector<8x128xf32>
    tpu.vector_store %arg26[%c0_83, %c0_84], %159 {strides = array<i32>} : memref<8x128xf32, #tpu.memory_space<vmem>>, vector<8x128xf32>,
    return
  }
  func.func @transform_0(%arg0: i32) -> (i32, i32) {
    %c0_i32 = arith.constant 0 : i32
    %c0_i32_0 = arith.constant 0 : i32
    %c0_i32_1 = arith.constant 0 : i32
    return %c0_i32, %c0_i32_0 : i32, i32
  }
  func.func @transform_1(%arg0: i32) -> (i32, i32) {
    %c0_i32 = arith.constant 0 : i32
    %c0_i32_0 = arith.constant 0 : i32
    %c0_i32_1 = arith.constant 0 : i32
    return %c0_i32, %c0_i32_0 : i32, i32
  }
  func.func @transform_2(%arg0: i32) -> (i32, i32) {
    %c0_i32 = arith.constant 0 : i32
    %c0_i32_0 = arith.constant 0 : i32
    %c0_i32_1 = arith.constant 0 : i32
    return %c0_i32, %c0_i32_0 : i32, i32
  }
  func.func @transform_3(%arg0: i32) -> (i32, i32) {
    %c0_i32 = arith.constant 0 : i32
    %c0_i32_0 = arith.constant 0 : i32
    %c0_i32_1 = arith.constant 0 : i32
    return %c0_i32, %c0_i32_0 : i32, i32
  }
  func.func @transform_4(%arg0: i32) -> (i32, i32) {
    %c0_i32 = arith.constant 0 : i32
    %c0_i32_0 = arith.constant 0 : i32
    %c0_i32_1 = arith.constant 0 : i32
    return %c0_i32, %c0_i32_0 : i32, i32
  }
  func.func @transform_5(%arg0: i32) -> (i32, i32) {
    %c0_i32 = arith.constant 0 : i32
    %c0_i32_0 = arith.constant 0 : i32
    %c0_i32_1 = arith.constant 0 : i32
    return %c0_i32, %c0_i32_0 : i32, i32
  }
  func.func @transform_6(%arg0: i32) -> (i32, i32) {
    %c0_i32 = arith.constant 0 : i32
    %c0_i32_0 = arith.constant 0 : i32
    %c0_i32_1 = arith.constant 0 : i32
    return %c0_i32, %c0_i32_0 : i32, i32
  }
  func.func @transform_7(%arg0: i32) -> (i32, i32) {
    %c0_i32 = arith.constant 0 : i32
    %c0_i32_0 = arith.constant 0 : i32
    %c0_i32_1 = arith.constant 0 : i32
    return %c0_i32, %c0_i32_0 : i32, i32
  }
  func.func @transform_8(%arg0: i32) -> (i32, i32) {
    %c0_i32 = arith.constant 0 : i32
    %c0_i32_0 = arith.constant 0 : i32
    %c0_i32_1 = arith.constant 0 : i32
    return %c0_i32, %c0_i32_0 : i32, i32
  }
  func.func @transform_9(%arg0: i32) -> (i32, i32) {
    %c0_i32 = arith.constant 0 : i32
    %c0_i32_0 = arith.constant 0 : i32
    %c0_i32_1 = arith.constant 0 : i32
    return %c0_i32, %c0_i32_0 : i32, i32
  }
  func.func @transform_10(%arg0: i32) -> (i32, i32) {
    %c0_i32 = arith.constant 0 : i32
    %c0_i32_0 = arith.constant 0 : i32
    %c0_i32_1 = arith.constant 0 : i32
    return %c0_i32, %c0_i32_0 : i32, i32
  }
  func.func @transform_11(%arg0: i32) -> (i32, i32) {
    %c0_i32 = arith.constant 0 : i32
    %c0_i32_0 = arith.constant 0 : i32
    %c0_i32_1 = arith.constant 0 : i32
    return %c0_i32, %c0_i32_0 : i32, i32
  }
  func.func @transform_12(%arg0: i32) -> (i32, i32) {
    %c0_i32 = arith.constant 0 : i32
    %c0_i32_0 = arith.constant 0 : i32
    %c0_i32_1 = arith.constant 0 : i32
    return %c0_i32, %c0_i32_0 : i32, i32
  }
  func.func @transform_13(%arg0: i32) -> (i32, i32) {
    %c0_i32 = arith.constant 0 : i32
    %c0_i32_0 = arith.constant 0 : i32
    %c0_i32_1 = arith.constant 0 : i32
    return %c0_i32, %c0_i32_0 : i32, i32
  }
  func.func @transform_14(%arg0: i32) -> (i32, i32) {
    %c0_i32 = arith.constant 0 : i32
    %c0_i32_0 = arith.constant 0 : i32
    %c0_i32_1 = arith.constant 0 : i32
    return %c0_i32, %c0_i32_0 : i32, i32
  }
  func.func @transform_15(%arg0: i32) -> (i32, i32) {
    %c0_i32 = arith.constant 0 : i32
    %c0_i32_0 = arith.constant 0 : i32
    %c0_i32_1 = arith.constant 0 : i32
    return %c0_i32, %c0_i32_0 : i32, i32
  }
  func.func @transform_16(%arg0: i32) -> (i32, i32) {
    %c0_i32 = arith.constant 0 : i32
    %c0_i32_0 = arith.constant 0 : i32
    %c0_i32_1 = arith.constant 0 : i32
    return %c0_i32, %c0_i32_0 : i32, i32
  }
  func.func @transform_17(%arg0: i32) -> (i32, i32) {
    %c0_i32 = arith.constant 0 : i32
    %c0_i32_0 = arith.constant 0 : i32
    %c0_i32_1 = arith.constant 0 : i32
    return %c0_i32, %c0_i32_0 : i32, i32
  }
  func.func @transform_18(%arg0: i32) -> (i32, i32) {
    %c0_i32 = arith.constant 0 : i32
    %c0_i32_0 = arith.constant 0 : i32
    %c0_i32_1 = arith.constant 0 : i32
    return %c0_i32, %c0_i32_0 : i32, i32
  }
  func.func @transform_19(%arg0: i32) -> (i32, i32) {
    %c0_i32 = arith.constant 0 : i32
    %c0_i32_0 = arith.constant 0 : i32
    %c0_i32_1 = arith.constant 0 : i32
    return %c0_i32, %c0_i32_0 : i32, i32
  }
  func.func @transform_20(%arg0: i32) -> (i32, i32) {
    %c0_i32 = arith.constant 0 : i32
    %c0_i32_0 = arith.constant 0 : i32
    %c0_i32_1 = arith.constant 0 : i32
    return %c0_i32, %c0_i32_0 : i32, i32
  }
  func.func @transform_21(%arg0: i32) -> (i32, i32) {
    %c0_i32 = arith.constant 0 : i32
    %c0_i32_0 = arith.constant 0 : i32
    %c0_i32_1 = arith.constant 0 : i32
    return %c0_i32, %c0_i32_0 : i32, i32
  }
  func.func @transform_22(%arg0: i32) -> (i32, i32) {
    %c0_i32 = arith.constant 0 : i32
    %c0_i32_0 = arith.constant 0 : i32
    %c0_i32_1 = arith.constant 0 : i32
    return %c0_i32, %c0_i32_0 : i32, i32
  }
  func.func @transform_23(%arg0: i32) -> (i32, i32) {
    %c0_i32 = arith.constant 0 : i32
    %c0_i32_0 = arith.constant 0 : i32
    %c0_i32_1 = arith.constant 0 : i32
    return %c0_i32, %c0_i32_0 : i32, i32
  }
  func.func @transform_24(%arg0: i32) -> (i32, i32) {
    %c0_i32 = arith.constant 0 : i32
    %c0_i32_0 = arith.constant 0 : i32
    %c0_i32_1 = arith.constant 0 : i32
    return %c0_i32, %c0_i32_0 : i32, i32
  }
  func.func @transform_25(%arg0: i32) -> (i32, i32) {
    %c0_i32 = arith.constant 0 : i32
    %c0_i32_0 = arith.constant 0 : i32
    %c0_i32_1 = arith.constant 0 : i32
    return %c0_i32, %c0_i32_0 : i32, i32
  }
}

</mosaic_0001>

<bundles_post_ra>
// kernel: tpu_custom_call.1
= control target key start
LH: loop header
LB: loop body
LE: loop exit
PB: predicated region body
PF: predicated region fallthrough
CT: control target
= control target key end

     0   :  { %s2970_s0 = inlined_call_operand.vmem [shape: s32[32,1], index: 0, kind: input, shape index: {}]   ;;  %s2971_s1 = inlined_call_operand.vmem [shape: f32[32,32], index: 1, kind: input, shape index: {}]   ;;  %s2972_s2 = inlined_call_operand.vmem [shape: f32[32,32], index: 2, kind: input, shape index: {}]   ;;  %s2973_s3 = inlined_call_operand.hbm [shape: f32[8,32], index: 3, kind: input, shape index: {}]   ;;  %s2974_s4 = inlined_call_operand.vmem [shape: f32[64,32], index: 4, kind: input, shape index: {}]   ;;  %s2975_s5 = inlined_call_operand.vmem [shape: f32[32,96], index: 5, kind: input, shape index: {}]   ;;  %s2976_s6 = inlined_call_operand.vmem [shape: f32[1,96], index: 6, kind: input, shape index: {}]   ;;  %s2977_s7 = inlined_call_operand.hbm [shape: f32[32,32], index: 7, kind: input, shape index: {}]   ;;  %s2978_s8 = inlined_call_operand.hbm [shape: f32[1,32], index: 8, kind: input, shape index: {}]   ;;  %s2979_s9 = inlined_call_operand.hbm [shape: f32[1,32], index: 9, kind: input, shape index: {}]   ;;  %s2980_s10 = inlined_call_operand.hbm [shape: f32[1,32], index: 10, kind: input, shape index: {}]   ;;  %s2981_s11 = inlined_call_operand.hbm [shape: f32[32,128], index: 11, kind: input, shape index: {}]   ;;  %s2982_s12 = inlined_call_operand.hbm [shape: f32[1,128], index: 12, kind: input, shape index: {}]   ;;  %s2983_s13 = inlined_call_operand.vmem [shape: f32[128,32], index: 13, kind: input, shape index: {}]   ;;  %s2984_s14 = inlined_call_operand.hbm [shape: f32[1,32], index: 14, kind: input, shape index: {}]   ;;  %s2985_s15 = inlined_call_operand.hbm [shape: f32[1,32], index: 15, kind: input, shape index: {}]   ;;  %s2986_s16 = inlined_call_operand.hbm [shape: f32[1,32], index: 16, kind: input, shape index: {}]   ;;  %s2987_s17 = inlined_call_operand.hbm [shape: f32[32,32], index: 17, kind: input, shape index: {}]   ;;  %s2988_s18 = inlined_call_operand.hbm [shape: f32[1,32], index: 18, kind: input, shape index: {}]   ;;  %s2989_s19 = inlined_call_operand.hbm [shape: f32[1,32], index: 19, kind: input, shape index: {}]   ;;  %s2990_s20 = inlined_call_operand.vmem [shape: f32[1,32], index: 20, kind: input, shape index: {}]   ;;  %s2991_s21 = inlined_call_operand.vmem [shape: f32[32,128], index: 21, kind: input, shape index: {}]   ;;  %s2992_s22 = inlined_call_operand.vmem [shape: f32[1,128], index: 22, kind: input, shape index: {}]   ;;  %s2993_s23 = inlined_call_operand.vmem [shape: f32[128,128], index: 23, kind: input, shape index: {}]   ;;  %s2994_s24 = inlined_call_operand.hbm [shape: f32[8,128], index: 24, kind: output, shape index: {0}]   ;;  %s2995_s25 = inlined_call_operand.hbm [shape: f32[8,128], index: 25, kind: output, shape index: {1}]  }
   0x1   :  { %3001 = sst [smem:[#allocation35_spill]] %s2970_s0 }
   0x2   :  { %3002 = sst [smem:[#allocation36_spill]] %s2971_s1 }
   0x3   :  { %3003 = sst [smem:[#allocation37_spill]] %s2972_s2 }
   0x4   :  { %3004 = sst [smem:[#allocation38_spill]] %s2973_s3 }
   0x5   :  { %3005 = sst [smem:[#allocation39_spill]] %s2974_s4 }
   0x6   :  { %3006 = sst [smem:[#allocation40_spill]] %s2975_s5 }
   0x7   :  { %3007 = sst [smem:[#allocation41_spill]] %s2976_s6 }
   0x8   :  { %3008 = sst [smem:[#allocation42_spill]] %s2977_s7 }
   0x9   :  { %3009 = sst [smem:[#allocation43_spill]] %s2978_s8 }
   0xa   :  { %3010 = sst [smem:[#allocation44_spill]] %s2979_s9 }
   0xb   :  { %31 = vsyncpa [#allocation3], 0 }
   0xc   :  { %32 = vsyncpa [#allocation6], 0 }
   0xd   :  { %33 = vsyncpa [#allocation9], 0 }
   0xe   :  { %34 = vsyncpa [#allocation12], 0 }
   0xf   :  { %35 = vsyncpa [#allocation15], 0 }
  0x10   :  { %36 = vsyncpa [#allocation18], 0 }
  0x11   :  { %37 = vsyncpa [#allocation21], 0 }
  0x12   :  { %38 = vsyncpa [#allocation4], 0 }
  0x13   :  { %39 = vsyncpa [#allocation25], 0  ;;  %s2418_s29 = smov [#allocation5]  }
  0x14   :  { %s67_s2 = sshll.u32 %s2418_s29, 4  ;;  %s68_s2 = int_to_ptr.vmem [resolvable:$true] %s67_s2 }
  0x15   :  { %s2108_s6 = scalar_lea.vmem %s68_s2, 512  ;;  %p2113_p1 = scmp.lt.s32.totalorder %s68_s2, %s68_s2 }
  0x16   :  { %p2109_p0 = scmp.ne.s32.totalorder %s68_s2, %s2108_s6  ;;  %p2114_p2 = scmp.lt.s32.totalorder %s2108_s6, %s2108_s6 }
  0x18   :  { %p2115_p3 = por %p2114_p2, %p2113_p1 }
  0x1a   :  { %p2116_p4 = pnand %p2115_p3, %p2109_p0 }
  0x1c   :  { %2119 = shalt.err (!%p2116_p4)
}
  0x1d   :  { %s2419_s30 = smov 128   ;;  %s2420_s7 = smov 8  }
  0x1e   :  { %s3011_s1 = sld [smem:[#allocation42_spill]]  ;;  %s2421_s8 = smov [#allocation8]  }
  0x1f   :  { %s90_s27 = sshll.u32 %s2421_s8, 4  ;;  %s2422_s4 = smov [#allocation11]   ;;  %s91_s27 = int_to_ptr.vmem [resolvable:$true] %s90_s27 }
  0x20   :  { %s109_s28 = sshll.u32 %s2422_s4, 4  ;;  %s2128_s9 = scalar_lea.vmem %s91_s27, 16  ;;  %s110_s28 = int_to_ptr.vmem [resolvable:$true] %s109_s28 }
  0x21   :  { %p2129_p5 = scmp.ne.s32.totalorder %s91_s27, %s2128_s9  ;;  %s2132_s5 = scalar_lea.vmem %s91_s27, 32 }
  0x22   :  { %p2133_p6 = scmp.lt.s32.totalorder %s91_s27, %s91_s27  ;;  %p2134_p7 = scmp.lt.s32.totalorder %s2132_s5, %s2128_s9 }
  0x24   :  { %73 = dma.hbm_to_vmem [thread:$0]  %s3011_s1, 512, %s68_s2, [#allocation6], %s2419_s30, %s2419_s30, %s2420_s7  }
  0x25   :  { %p2135_p8 = por %p2134_p7, %p2133_p6 }
  0x27   :  { %p2136_p9 = pnand %p2135_p8, %p2129_p5 }
  0x29   :  { %2139 = shalt.err (!%p2136_p9)
}
  0x2a   :  { %s3012_s6 = sld [smem:[#allocation44_spill]]  ;;  %s2148_s3 = scalar_lea.vmem %s110_s28, 512 }
  0x2b   :  { %p2149_p10 = scmp.ne.s32.totalorder %s110_s28, %s2148_s3  ;;  %p2153_p11 = scmp.lt.s32.totalorder %s110_s28, %s110_s28 }
  0x2c   :  { %p2154_p12 = scmp.lt.s32.totalorder %s2148_s3, %s2148_s3 }
  0x2e   :  { %p2155_p13 = por %p2154_p12, %p2153_p11 }
  0x30   :  { %93 = dma.hbm_to_vmem [thread:$0]  %s3012_s6, 16, %s91_s27, [#allocation9]  }
  0x31   :  { %p2156_p0 = pnand %p2155_p13, %p2149_p10 }
  0x33   :  { %2159 = shalt.err (!%p2156_p0)
}
  0x34   :  { %115 = dma.hbm_to_vmem [thread:$0]  %s2981_s11, 512, %s110_s28, [#allocation12], %s2419_s30, %s2419_s30, %s2420_s7  }
  0x35   :  { %s2423_s1 = smov [#allocation14]   ;;  %s2424_s4 = smov [#allocation17]  }
  0x36   :  { %s134_s8 = sshll.u32 %s2423_s1, 4  ;;  %s154_s27 = sshll.u32 %s2424_s4, 4  ;;  %s135_s8 = int_to_ptr.vmem [resolvable:$true] %s134_s8  ;;  %s155_s27 = int_to_ptr.vmem [resolvable:$true] %s154_s27 }
  0x37   :  { %s2168_s9 = scalar_lea.vmem %s135_s8, 16  ;;  %s2172_s5 = scalar_lea.vmem %s135_s8, 32 }
  0x38   :  { %p2169_p1 = scmp.ne.s32.totalorder %s135_s8, %s2168_s9  ;;  %p2173_p2 = scmp.lt.s32.totalorder %s135_s8, %s135_s8 }
  0x39   :  { %p2174_p3 = scmp.lt.s32.totalorder %s2172_s5, %s2168_s9 }
  0x3b   :  { %p2175_p4 = por %p2174_p3, %p2173_p2 }
  0x3d   :  { %p2176_p5 = pnand %p2175_p4, %p2169_p1 }
  0x3f   :  { %2179 = shalt.err (!%p2176_p5)
}
  0x40   :  { %137 = dma.hbm_to_vmem [thread:$0]  %s2984_s14, 16, %s135_s8, [#allocation15]  }
  0x41   :  { %s2188_s6 = scalar_lea.vmem %s155_s27, 16  ;;  %s2192_s11 = scalar_lea.vmem %s155_s27, 32 }
  0x42   :  { %p2189_p6 = scmp.ne.s32.totalorder %s155_s27, %s2188_s6  ;;  %p2193_p7 = scmp.lt.s32.totalorder %s155_s27, %s155_s27 }
  0x43   :  { %p2194_p8 = scmp.lt.s32.totalorder %s2192_s11, %s2188_s6 }
  0x45   :  { %p2195_p9 = por %p2194_p8, %p2193_p7 }
  0x47   :  { %p2196_p10 = pnand %p2195_p9, %p2189_p6 }
  0x49   :  { %2199 = shalt.err (!%p2196_p10)
}
  0x4a   :  { %157 = dma.hbm_to_vmem [thread:$0]  %s2986_s16, 16, %s155_s27, [#allocation18]  }
  0x4b   :  { %s2425_s2 = smov [#allocation20]   ;;  %s2426_s1 = smov [#allocation2]  }
  0x4c   :  { %s176_s26 = sshll.u32 %s2425_s2, 4  ;;  %s52_s4 = sshll.u32 %s2426_s1, 4  ;;  %s177_s26 = int_to_ptr.vmem [resolvable:$true] %s176_s26  ;;  %s53_s4 = int_to_ptr.vmem [resolvable:$true] %s52_s4 }
  0x4d   :  { %s2208_s9 = scalar_lea.vmem %s177_s26, 16  ;;  %s2212_s14 = scalar_lea.vmem %s177_s26, 32 }
  0x4e   :  { %p2209_p11 = scmp.ne.s32.totalorder %s177_s26, %s2208_s9  ;;  %p2213_p12 = scmp.lt.s32.totalorder %s177_s26, %s177_s26 }
  0x4f   :  { %p2214_p13 = scmp.lt.s32.totalorder %s2212_s14, %s2208_s9 }
  0x51   :  { %p2215_p0 = por %p2214_p13, %p2213_p12 }
  0x53   :  { %p2216_p1 = pnand %p2215_p0, %p2209_p11 }
  0x55   :  { %2219 = shalt.err (!%p2216_p1)
}
  0x56   :  { %179 = dma.hbm_to_vmem [thread:$0]  %s2988_s18, 16, %s177_s26, [#allocation21]  }
  0x57   :  { %s2228_s0 = scalar_lea.vmem %s53_s4, 128  ;;  %p2233_p3 = scmp.lt.s32.totalorder %s53_s4, %s53_s4 }
  0x58   :  { %p2229_p2 = scmp.ne.s32.totalorder %s53_s4, %s2228_s0  ;;  %p2234_p4 = scmp.lt.s32.totalorder %s2228_s0, %s2228_s0 }
  0x5a   :  { %p2235_p5 = por %p2234_p4, %p2233_p3 }
  0x5c   :  { %p2236_p6 = pnand %p2235_p5, %p2229_p2 }
  0x5e   :  { %2239 = shalt.err (!%p2236_p6)
}
  0x5f   :  { %s3013_s29 = sld [smem:[#allocation38_spill]]  ;;  %s2427_s6 = smov [#allocation7]  }
  0x60   :  { %s80_s11 = sshll.u32 %s2427_s6, 4  ;;  %s2428_s28 = smov [#allocation10]   ;;  %s81_s11 = int_to_ptr.vmem [resolvable:$true] %s80_s11 }
  0x61   :  { %s100_s3 = sshll.u32 %s2428_s28, 4  ;;  %s2248_s2 = scalar_lea.vmem %s81_s11, 16  ;;  %s101_s3 = int_to_ptr.vmem [resolvable:$true] %s100_s3 }
  0x62   :  { %p2249_p7 = scmp.ne.s32.totalorder %s81_s11, %s2248_s2  ;;  %s2252_s18 = scalar_lea.vmem %s81_s11, 32 }
  0x63   :  { %p2253_p8 = scmp.lt.s32.totalorder %s81_s11, %s81_s11  ;;  %p2254_p9 = scmp.lt.s32.totalorder %s2252_s18, %s2248_s2 }
  0x65   :  { %55 = dma.hbm_to_vmem [thread:$0]  %s3013_s29, 128, %s53_s4, [#allocation3]  }
  0x66   :  { %p2255_p10 = por %p2254_p9, %p2253_p8 }
  0x68   :  { %p2256_p11 = pnand %p2255_p10, %p2249_p7 }
  0x6a   :  { %2259 = shalt.err (!%p2256_p11)
}
  0x6b   :  { %s3014_s9 = sld [smem:[#allocation43_spill]]  ;;  %s2268_s14 = scalar_lea.vmem %s101_s3, 16 }
  0x6c   :  { %p2269_p12 = scmp.ne.s32.totalorder %s101_s3, %s2268_s14  ;;  %s2272_s4 = scalar_lea.vmem %s101_s3, 32 }
  0x6d   :  { %p2273_p13 = scmp.lt.s32.totalorder %s101_s3, %s101_s3  ;;  %p2274_p0 = scmp.lt.s32.totalorder %s2272_s4, %s2268_s14 }
  0x6f   :  { %p2275_p1 = por %p2274_p0, %p2273_p13 }
  0x71   :  { %83 = dma.hbm_to_vmem [thread:$0]  %s3014_s9, 16, %s81_s11, [#allocation6]  }
  0x72   :  { %p2276_p2 = pnand %p2275_p1, %p2269_p12 }
  0x74   :  { %2279 = shalt.err (!%p2276_p2)
}
  0x75   :  { %103 = dma.hbm_to_vmem [thread:$0]  %s2980_s10, 16, %s101_s3, [#allocation9]  }
  0x76   :  { %s2429_s0 = smov [#allocation13]   ;;  %s2430_s27 = smov [#allocation16]  }
  0x77   :  { %s122_s16 = sshll.u32 %s2429_s0, 4  ;;  %s144_s29 = sshll.u32 %s2430_s27, 4  ;;  %s123_s16 = int_to_ptr.vmem [resolvable:$true] %s122_s16  ;;  %s145_s29 = int_to_ptr.vmem [resolvable:$true] %s144_s29 }
  0x78   :  { %s2288_s6 = scalar_lea.vmem %s123_s16, 16  ;;  %s2292_s11 = scalar_lea.vmem %s123_s16, 32 }
  0x79   :  { %p2289_p3 = scmp.ne.s32.totalorder %s123_s16, %s2288_s6  ;;  %p2293_p4 = scmp.lt.s32.totalorder %s123_s16, %s123_s16 }
  0x7a   :  { %p2294_p5 = scmp.lt.s32.totalorder %s2292_s11, %s2288_s6 }
  0x7c   :  { %p2295_p6 = por %p2294_p5, %p2293_p4 }
  0x7e   :  { %p2296_p7 = pnand %p2295_p6, %p2289_p3 }
  0x80   :  { %2299 = shalt.err (!%p2296_p7)
}
  0x81   :  { %125 = dma.hbm_to_vmem [thread:$0]  %s2982_s12, 16, %s123_s16, [#allocation12]  }
  0x82   :  { %s2308_s18 = scalar_lea.vmem %s145_s29, 16  ;;  %s2312_s10 = scalar_lea.vmem %s145_s29, 32 }
  0x83   :  { %p2309_p8 = scmp.ne.s32.totalorder %s145_s29, %s2308_s18  ;;  %p2313_p9 = scmp.lt.s32.totalorder %s145_s29, %s145_s29 }
  0x84   :  { %p2314_p10 = scmp.lt.s32.totalorder %s2312_s10, %s2308_s18 }
  0x86   :  { %p2315_p11 = por %p2314_p10, %p2313_p9 }
  0x88   :  { %p2316_p12 = pnand %p2315_p11, %p2309_p8 }
  0x8a   :  { %2319 = shalt.err (!%p2316_p12)
}
  0x8b   :  { %147 = dma.hbm_to_vmem [thread:$0]  %s2985_s15, 16, %s145_s29, [#allocation15]  }
  0x8c   :  { %s2431_s1 = smov [#allocation19]   ;;  %s2432_s14 = smov [#allocation22]  }
  0x8d   :  { %s163_s9 = sshll.u32 %s2431_s1, 4  ;;  %s186_s4 = sshll.u32 %s2432_s14, 4  ;;  %s164_s9 = int_to_ptr.vmem [resolvable:$true] %s163_s9  ;;  %s187_s4 = int_to_ptr.vmem [resolvable:$true] %s186_s4 }
  0x8e   :  { %s2328_s8 = scalar_lea.vmem %s164_s9, 512  ;;  %p2333_p0 = scmp.lt.s32.totalorder %s164_s9, %s164_s9 }
  0x8f   :  { %p2329_p13 = scmp.ne.s32.totalorder %s164_s9, %s2328_s8  ;;  %p2334_p1 = scmp.lt.s32.totalorder %s2328_s8, %s2328_s8 }
  0x91   :  { %p2335_p2 = por %p2334_p1, %p2333_p0 }
  0x93   :  { %p2336_p3 = pnand %p2335_p2, %p2329_p13 }
  0x95   :  { %2339 = shalt.err (!%p2336_p3)
}
  0x96   :  { %169 = dma.hbm_to_vmem [thread:$0]  %s2987_s17, 512, %s164_s9, [#allocation18], %s2419_s30, %s2419_s30, %s2420_s7  }
  0x97   :  { %s2348_s15 = scalar_lea.vmem %s187_s4, 16  ;;  %s2352_s0 = scalar_lea.vmem %s187_s4, 32 }
  0x98   :  { %p2349_p4 = scmp.ne.s32.totalorder %s187_s4, %s2348_s15  ;;  %p2353_p5 = scmp.lt.s32.totalorder %s187_s4, %s187_s4 }
  0x99   :  { %p2354_p6 = scmp.lt.s32.totalorder %s2352_s0, %s2348_s15 }
  0x9b   :  { %p2355_p7 = por %p2354_p6, %p2353_p5 }
  0x9d   :  { %p2356_p8 = pnand %p2355_p7, %p2349_p4 }
  0x9f   :  { %2359 = shalt.err (!%p2356_p8)
}
  0xa0   :  { %189 = dma.hbm_to_vmem [thread:$0]  %s2989_s19, 16, %s187_s4, [#allocation21]  }
  0xa1   :  { %2400 = dma.done.wait [#allocation3], 128  }
  0xa2   :  { %2401 = vsyncadd [#allocation3], 4294967168 }
  0xa3   :  { %2402 = dma.done.wait [#allocation6], 528  }
  0xa4   :  { %2403 = vsyncadd [#allocation6], 4294966768 }
  0xa5   :  { %2404 = dma.done.wait [#allocation9], 32  }
  0xa6   :  { %2405 = vsyncadd [#allocation9], 4294967264 }
  0xa7   :  { %2406 = dma.done.wait [#allocation12], 528  }
  0xa8   :  { %2407 = vsyncadd [#allocation12], 4294966768 }
  0xa9   :  { %2408 = dma.done.wait [#allocation15], 32  }
  0xaa   :  { %2409 = vsyncadd [#allocation15], 4294967264 }
  0xab   :  { %2410 = dma.done.wait [#allocation18], 528  }
  0xac   :  { %2411 = vsyncadd [#allocation18], 4294966768 }
  0xad   :  { %2412 = dma.done.wait [#allocation21], 32  }
  0xae   :  { %2413 = vsyncadd [#allocation21], 4294967264  ;;  %v2433_v0 = vmov 0   ;;  %s3015_s19 = sld [smem:[#allocation35_spill]]  ;;  %v241_v14 = vlaneseq  ;;  %vm279_vm0 = vcmask 523264   ;;  %v2434_v18 = vmov 0.0  }
  0xaf   :  { %2053 = vset.pattern.permute.xlu1 %v2433_v0  ;;  %2052 = vset.pattern.permute.xlu0 %v2433_v0  ;;  %s3016_s28 = sld [smem:[#allocation39_spill]]  ;;  %vm388_vm5 = vcmask 261120   ;;  %s2435_s27 = smov 96   ;;  %vm2437_vm6 = vmmov 0  }
  0xb0   :  { %s3017_s29 = sld [smem:[#allocation40_spill]]  ;;  %v242_v15 = vand.u32 127, %v241_v14  ;;  %s2436_s18 = smov 64  }
  0xb1   :  { %s3018_s1 = sld [smem:[#allocation36_spill]] }
  0xb2   :  { %s3019_s16 = sld [smem:[#allocation41_spill]] }
  0xb4   :  { %v239_v1 = vld [vmem:[%s3015_s19 + $0x10] sm:$0xff]  ;;  %v237_v2 = vld [vmem:[%s3015_s19] sm:$0xff]  ;;  %v240_v5 = vld [vmem:[%s3015_s19 + $0x18] sm:$0xff] }
  0xb5   :  { %250 = vperm.xlu1 %2053, %v239_v1   ;;  %244 = vperm.xlu0 %2052, %v237_v2   ;;  %v274_v3 = vld [vmem:[%s3016_s28 + $0x38] sm:$0xff]  ;;  %v273_v4 = vld [vmem:[%s3016_s28 + $0x30] sm:$0xff]  ;;  %v238_v6 = vld [vmem:[%s3015_s19 + $0x8] sm:$0xff]  ;;  %s3020_s19 = sld [smem:[#allocation37_spill]] }
  0xb6   :  { %1832 = vmatprep.subr.mxu0 %v274_v3  ;;  %v272_v7 = vld [vmem:[%s3016_s28 + $0x28] sm:$0xff]  ;;  %v271_v8 = vld [vmem:[%s3016_s28 + $0x20] sm:$0xff]  ;;  %v270_v9 = vld [vmem:[%s3016_s28 + $0x18] sm:$0xff] }
  0xb7   :  { %1833 = vmatpush3.msra.mxu0 %v274_v3  ;;  %v269_v10 = vld [vmem:[%s3016_s28 + $0x10] sm:$0xff]  ;;  %v268_v11 = vld [vmem:[%s3016_s28 + $0x8] sm:$0xff]  ;;  %v267_v12 = vld [vmem:[%s3016_s28] sm:$0xff] }
  0xb8   :  { %1834 = vmatprep.subr.mxu0 %v273_v4  ;;  %v380_v13 = vld [vmem:[%s3017_s29 + $0x18] sm:$0xff]  ;;  %v379_v25 = vld [vmem:[%s3017_s29 + $0x10] sm:$0xff]  ;;  %v378_v26 = vld [vmem:[%s3017_s29 + $0x8] sm:$0xff] }
  0xb9   :  { %253 = vperm.xlu1 %2053, %v240_v5   ;;  %247 = vperm.xlu0 %2052, %v238_v6   ;;  %v377_v27 = vld [vmem:[%s3017_s29] sm:$0xff]  ;;  %v276_v30 = vld [vmem:[%s3018_s1 + $0x8] sm:$0xff]  ;;  %v277_v35 = vld [vmem:[%s3018_s1 + $0x10] sm:$0xff] }
  0xba   :  { %1835 = vmatpush3.msra.mxu0 %v273_v4  ;;  %v275_v29 = vld [vmem:[%s3018_s1] sm:$0xff]  ;;  %v278_v36 = vld [vmem:[%s3018_s1 + $0x18] sm:$0xff] }
  0xbb   :  { %1836 = vmatprep.subr.mxu0 %v272_v7  ;;  %v1689_v41 = vld [vmem:[%s3019_s16] ss:$0 sm:$0xff]  ;;  %v487_v53 = vld [vmem:[%s3020_s19 + $0x8] sm:$0xff]  ;;  %v488_v61 = vld [vmem:[%s3020_s19 + $0x10] sm:$0xff] }
  0xbc   :  { %1837 = vmatpush3.msra.mxu0 %v272_v7  ;;  %v486_v55 = vld [vmem:[%s3020_s19] sm:$0xff]  ;;  %v489_v63 = vld [vmem:[%s3020_s19 + $0x18] sm:$0xff] }
  0xbd   :  { %1838 = vmatprep.subr.mxu0 %v271_v8 }
  0xbe   :  { %1839 = vmatpush3.msra.mxu0 %v271_v8 }
  0xbf   :  { %1840 = vmatprep.subr.mxu0 %v270_v9 }
  0xc0   :  { %1841 = vmatpush3.msra.mxu0 %v270_v9 }
  0xc1   :  { %1842 = vmatprep.subr.mxu0 %v269_v10 }
  0xc2   :  { %1843 = vmatpush3.msra.mxu0 %v269_v10 }
  0xc3   :  { %1844 = vmatprep.subr.mxu0 %v268_v11 }
  0xc4   :  { %1845 = vmatpush3.msra.mxu0 %v268_v11 }
  0xc5   :  { %1846 = vmatprep.subr.mxu0 %v267_v12 }
  0xc6   :  { %1847 = vmatpush3.msra.mxu0 %v267_v12 }
  0xc7   :  { %1854 = vmatprep.subr.mxu0 %v380_v13 }
 0x130   :  { %v251_v16 = vpop.permute.xlu1 %250  ;;  %v245_v17 = vpop.permute.xlu0 %244 }
 0x131   :  { %vm255_vm1 = vcmp.eq.s32.totalorder %v245_v17, %v242_v15  ;;  %vm257_vm2 = vcmp.eq.s32.totalorder %v251_v16, %v242_v15 }
 0x132   :  { %v1681_v19 = vsel %vm255_vm1, 1.0, %v2434_v18  ;;  %v1683_v22 = vsel %vm257_vm2, 1.0, %v2434_v18 }
 0x133   :  { %1848 = vmatprep.mubr.msk.f32.mxu0 %vm279_vm0, %v1681_v19 }
 0x134   :  { %v254_v20 = vpop.permute.xlu1 %253  ;;  %v248_v21 = vpop.permute.xlu0 %247 }
 0x135   :  { %vm256_vm3 = vcmp.eq.s32.totalorder %v248_v21, %v242_v15  ;;  %vm258_vm4 = vcmp.eq.s32.totalorder %v254_v20, %v242_v15 }
 0x136   :  { %v1682_v23 = vsel %vm256_vm3, 1.0, %v2434_v18  ;;  %v1684_v24 = vsel %vm258_vm4, 1.0, %v2434_v18 }
 0x137   :  { %1849 = vmatmul.mubr.msk.f32.vlgmr.msra.gmra.mxu0 %vm279_vm0, %v1682_v23 }
 0x138   :  { %1851 = vmatprep.mubr.msk.f32.mxu0 %vm279_vm0, %v1683_v22  ;;  %1855 = vmatpush3.msra.mxu0 %v380_v13 }
 0x139   :  { %1856 = vmatprep.subr.mxu0 %v379_v25 }
 0x13a   :  { %1857 = vmatpush3.msra.mxu0 %v379_v25 }
 0x13b   :  { %1852 = vmatmul.mubr.msk.f32.gmra.mxu0 %vm279_vm0, %v1684_v24  ;;  %1858 = vmatprep.subr.mxu0 %v378_v26 }
 0x13c   :  { %1859 = vmatpush3.msra.mxu0 %v378_v26 }
 0x13d   :  { %1860 = vmatprep.subr.mxu0 %v377_v27 }
 0x13e   :  { %1861 = vmatpush3.msra.mxu0 %v377_v27 }
 0x1f7   :  { %v1850_v28 = vpop.f32.mrf.mxu0 }
 0x1f8   :  { %v2682_v33 = vadd.f32 %v1850_v28, %v276_v30 }
 0x1f9   :  { %v358_v31 = vpop.f32.mrf.mxu0 }
 0x1fa   :  { %v2680_v32 = vadd.f32 %v358_v31, %v275_v29 }
 0x1fb   :  { %v1853_v34 = vpop.f32.mrf.mxu0 }
 0x1fc   :  { %1862 = vmatprep.mubr.msk.f32.mxu0 %vm388_vm5, %v2680_v32  ;;  %v2696_v39 = vadd.f32 %v1853_v34, %v278_v36 }
 0x1fd   :  { %v368_v37 = vpop.f32.mrf.mxu0  ;;  %1863 = vmatmul.mubr.msk.f32.vlgmr.msra.gmra.mxu0 %vm388_vm5, %v2682_v33 }
 0x1fe   :  { %v2694_v38 = vadd.f32 %v368_v37, %v277_v35 }
 0x200   :  { %1865 = vmatprep.mubr.msk.f32.mxu0 %vm388_vm5, %v2694_v38 }
 0x201   :  { %1866 = vmatmul.mubr.msk.f32.gmra.mxu0 %vm388_vm5, %v2696_v39 }
 0x2bd   :  { %v1864_v40 = vpop.f32.mrf.mxu0 }
 0x2be   :  { %v2711_v48 = vadd.f32 %v1864_v40, %v1689_v41 }
 0x2bf   :  { %v467_v42 = vpop.f32.mrf.mxu0 }
 0x2c0   :  { %v2705_v43 = vadd.f32 %v1689_v41, %v467_v42 }
 0x2c1   :  { %v1867_v44 = vpop.f32.mrf.mxu0 }
 0x2c2   :  { %v483_v45 = vadd.f32 %v1867_v44, %v1689_v41  ;;  %1876 = vmatprep.mubr.msk.f32.mxu1 %vm388_vm5, %v2705_v43 }
 0x2c3   :  { %v477_v46 = vpop.f32.mrf.mxu0 }
 0x2c4   :  { %v2709_v47 = vadd.f32 %v1689_v41, %v477_v46  ;;  %500 = vrot.lane.b32.xlu0 %v483_v45, %s2435_s27  ;;  %v759_v41 = vld [vmem:[#allocation5 + $0x18] sm:$0xff] }
 0x2c6   :  { %498 = vrot.lane.b32.xlu1 %v2709_v47, %s2435_s27 }
 0x2c8   :  { %496 = vrot.lane.b32.xlu0 %v2711_v48, %s2435_s27 }
 0x2ca   :  { %494 = vrot.lane.b32.xlu1 %v2705_v43, %s2435_s27 }
 0x336   :  { %v501_v49 = vpop.permute.xlu0 %500 }
 0x337   :  { %1868 = vmatprep.subr.msk.mxu1 %vm388_vm5, %v501_v49 }
 0x338   :  { %1869 = vmatpush3.xpose.msk.msra.mxu1 %vm388_vm5, %v501_v49  ;;  %v499_v50 = vpop.permute.xlu1 %498  ;;  %v756_v49 = vld [vmem:[#allocation5] sm:$0xff] }
 0x339   :  { %1870 = vmatprep.subr.msk.mxu1 %vm388_vm5, %v499_v50 }
 0x33a   :  { %v497_v51 = vpop.permute.xlu0 %496 }
 0x33c   :  { %1871 = vmatpush3.xpose.msk.msra.mxu1 %vm388_vm5, %v499_v50  ;;  %v495_v52 = vpop.permute.xlu1 %494 }
 0x33d   :  { %1872 = vmatprep.subr.msk.mxu1 %vm388_vm5, %v497_v51 }
 0x340   :  { %1873 = vmatpush3.xpose.msk.msra.mxu1 %vm388_vm5, %v497_v51 }
 0x341   :  { %1874 = vmatprep.subr.msk.mxu1 %vm388_vm5, %v495_v52 }
 0x344   :  { %1875 = vmatpush3.xpose.msk.msra.mxu1 %vm388_vm5, %v495_v52 }
 0x347   :  { %1877 = vmatmul.mubr.msk.f32.vlgmr.msra.gmra.mxu1 %vm388_vm5, %v2711_v48 }
 0x348   :  { %1879 = vmatprep.mubr.msk.f32.mxu1 %vm388_vm5, %v2709_v47 }
 0x34b   :  { %1880 = vmatmul.mubr.msk.f32.gmra.mxu1 %vm388_vm5, %v483_v45 }
 0x407   :  { %v1878_v54 = vpop.f32.mrf.mxu1 }
 0x408   :  { %v590_v56 = vadd.f32 %v1878_v54, %v487_v53  ;;  %v1706_v54 = vld [vmem:[#allocation7] ss:$0 sm:$0xff] }
 0x409   :  { %v584_v57 = vpop.f32.mrf.mxu1 }
 0x40a   :  { %v585_v58 = vadd.f32 %v584_v57, %v486_v55  ;;  %v606_v59 = vsel %vm388_vm5, %v590_v56, -inf }
 0x40b   :  { %607 = vmax.xlane.f32.xlu1 %v606_v59  ;;  %v1881_v60 = vpop.f32.mrf.mxu1 }
 0x40c   :  { %v603_v62 = vsel %vm388_vm5, %v585_v58, -inf  ;;  %v600_v2 = vadd.f32 %v1881_v60, %v489_v63 }
 0x40d   :  { %v594_v0 = vpop.f32.mrf.mxu1  ;;  %604 = vmax.xlane.f32.xlu0 %v603_v62 }
 0x40e   :  { %v595_v1 = vadd.f32 %v594_v0, %v488_v61  ;;  %v612_v4 = vsel %vm388_vm5, %v600_v2, -inf }
 0x410   :  { %v609_v3 = vsel %vm388_vm5, %v595_v1, -inf }
 0x411   :  { %610 = vmax.xlane.f32.xlu0 %v609_v3 }
 0x415   :  { %613 = vmax.xlane.f32.xlu0 %v612_v4 }
 0x41c   :  { %653 = vrot.lane.b32.xlu1 %v483_v45, %s2436_s18 }
 0x494   :  { %v608_v5 = vpop.xlane.xlu1 %607 }
 0x495   :  { %v616_v6 = vsub.f32 %v590_v56, %v608_v5 }
 0x496   :  { %v605_v7 = vpop.xlane.xlu0 %604 }
 0x497   :  { %v621_v8 = vmul.f32 1.442695, %v616_v6  ;;  %v615_v9 = vsub.f32 %v585_v58, %v605_v7 }
 0x498   :  { %v654_v10 = vpop.permute.xlu1 %653 }
 0x499   :  { %2054 = vpow2.f32 %v621_v8  ;;  %v619_v11 = vmul.f32 1.442695, %v615_v9  ;;  %1882 = vmatprep.subr.mxu0 %v654_v10 }
 0x49a   :  { %1883 = vmatpush3.msra.mxu0 %v654_v10  ;;  %v611_v12 = vpop.xlane.xlu0 %610 }
 0x49b   :  { %2056 = vpow2.f32 %v619_v11  ;;  %v617_v23 = vsub.f32 %v595_v1, %v611_v12 }
 0x49d   :  { %v623_v24 = vmul.f32 1.442695, %v617_v23 }
 0x49e   :  { %v614_v13 = vpop.xlane.xlu0 %613 }
 0x49f   :  { %v618_v14 = vsub.f32 %v600_v2, %v614_v13 }
 0x4a1   :  { %v625_v15 = vmul.f32 1.442695, %v618_v14 }
 0x4a3   :  { %2058 = vpow2.f32 %v625_v15 }
 0x4a4   :  { %2060 = vpow2.f32 %v623_v24  ;;  %v946_v24 = vld [vmem:[#allocation11 + $0x18] sm:$0xff] }
 0x4a5   :  { %1910 = vmatprep.subr.mxu1 %v946_v24 }
 0x4a6   :  { %v2055_v16 = vpop.eup %2054  ;;  %1911 = vmatpush3.msra.mxu1 %v946_v24 }
 0x4a7   :  { %v630_v17 = vsel %vm388_vm5, %v2055_v16, 0.0 }
 0x4a8   :  { %v2057_v19 = vpop.eup %2056  ;;  %631 = vadd.xlane.f32.xlu0 %v630_v17 }
 0x4a9   :  { %v627_v20 = vsel %vm388_vm5, %v2057_v19, 0.0 }
 0x4aa   :  { %628 = vadd.xlane.f32.xlu1 %v627_v20 }
 0x4b0   :  { %v2059_v21 = vpop.eup %2058 }
 0x4b1   :  { %v636_v22 = vsel %vm388_vm5, %v2059_v21, 0.0  ;;  %v2061_v25 = vpop.eup %2060 }
 0x4b2   :  { %637 = vadd.xlane.f32.xlu0 %v636_v22  ;;  %v633_v26 = vsel %vm388_vm5, %v2061_v25, 0.0 }
 0x4bb   :  { %649 = vrot.lane.b32.xlu1 %v2711_v48, %s2436_s18  ;;  %v757_v48 = vld [vmem:[#allocation5 + $0x8] sm:$0xff] }
 0x4c8   :  { %651 = vrot.lane.b32.xlu0 %v2709_v47, %s2436_s18 }
 0x4df   :  { %634 = vadd.xlane.f32.xlu1 %v633_v26  ;;  %v944_v26 = vld [vmem:[#allocation11 + $0x8] sm:$0xff] }
 0x4f0   :  { %647 = vrot.lane.b32.xlu1 %v2705_v43, %s2436_s18  ;;  %v758_v43 = vld [vmem:[#allocation5 + $0x10] sm:$0xff] }
 0x531   :  { %v632_v28 = vpop.xlane.xlu0 %631 }
 0x533   :  { %v629_v27 = vpop.xlane.xlu1 %628 }
 0x534   :  { %2062 = vrcp.f32 %v629_v27  ;;  %v943_v27 = vld [vmem:[#allocation11] sm:$0xff] }
 0x535   :  { %2064 = vrcp.f32 %v632_v28 }
 0x537   :  { %v650_v34 = vpop.permute.xlu1 %649 }
 0x53b   :  { %v638_v29 = vpop.xlane.xlu0 %637 }
 0x53c   :  { %2066 = vrcp.f32 %v638_v29 }
 0x53f   :  { %v652_v30 = vpop.permute.xlu0 %651 }
 0x540   :  { %1884 = vmatprep.subr.mxu0 %v652_v30 }
 0x541   :  { %v2063_v31 = vpop.eup %2062  ;;  %1885 = vmatpush3.msra.mxu0 %v652_v30 }
 0x542   :  { %1886 = vmatprep.subr.mxu0 %v650_v34  ;;  %v643_v35 = vmul.f32 %v2063_v31, %v2057_v19  ;;  %v2065_v37 = vpop.eup %2064 }
 0x543   :  { %1887 = vmatpush3.msra.mxu0 %v650_v34  ;;  %v644_v42 = vmul.f32 %v2065_v37, %v2055_v16 }
 0x544   :  { %1890 = vmatprep.mubr.msk.f32.mxu0 %vm388_vm5, %v643_v35 }
 0x549   :  { %v2067_v44 = vpop.eup %2066 }
 0x54a   :  { %v646_v47 = vmul.f32 %v2067_v44, %v2059_v21 }
 0x568   :  { %v635_v36 = vpop.xlane.xlu1 %634 }
 0x569   :  { %2068 = vrcp.f32 %v635_v36 }
 0x56c   :  { %v648_v40 = vpop.permute.xlu1 %647 }
 0x56d   :  { %1888 = vmatprep.subr.mxu0 %v648_v40 }
 0x56e   :  { %1889 = vmatpush3.msra.mxu0 %v648_v40 }
 0x56f   :  { %1891 = vmatmul.mubr.msk.f32.vlgmr.msra.gmra.mxu0 %vm388_vm5, %v644_v42  ;;  %1896 = vmatprep.subr.mxu0 %v759_v41 }
 0x570   :  { %1897 = vmatpush3.msra.mxu0 %v759_v41 }
 0x571   :  { %1898 = vmatprep.subr.mxu0 %v758_v43 }
 0x572   :  { %1899 = vmatpush3.msra.mxu0 %v758_v43 }
 0x573   :  { %1900 = vmatprep.subr.mxu0 %v757_v48 }
 0x574   :  { %1901 = vmatpush3.msra.mxu0 %v757_v48 }
 0x575   :  { %1902 = vmatprep.subr.mxu0 %v756_v49 }
 0x576   :  { %v2069_v45 = vpop.eup %2068  ;;  %1903 = vmatpush3.msra.mxu0 %v756_v49 }
 0x577   :  { %v645_v46 = vmul.f32 %v2069_v45, %v2061_v25  ;;  %v945_v25 = vld [vmem:[#allocation11 + $0x10] sm:$0xff]  ;;  %v1711_v45 = vld [vmem:[#allocation8] ss:$0 sm:$0xff] }
 0x578   :  { %1912 = vmatprep.subr.mxu1 %v945_v25 }
 0x579   :  { %1893 = vmatprep.mubr.msk.f32.mxu0 %vm388_vm5, %v645_v46  ;;  %1913 = vmatpush3.msra.mxu1 %v945_v25 }
 0x57a   :  { %1894 = vmatmul.mubr.msk.f32.gmra.mxu0 %vm388_vm5, %v646_v47  ;;  %1914 = vmatprep.subr.mxu1 %v944_v26 }
 0x57b   :  { %1915 = vmatpush3.msra.mxu1 %v944_v26 }
 0x57c   :  { %1916 = vmatprep.subr.mxu1 %v943_v27 }
 0x57d   :  { %1917 = vmatpush3.msra.mxu1 %v943_v27 }
 0x57e   :  { %1962 = vmatprep.subr.mxu1 %v2434_v18 }
 0x62f   :  { %v1892_v50 = vpop.f32.mrf.mxu0 }
 0x631   :  { %v737_v51 = vpop.f32.mrf.mxu0 }
 0x632   :  { %1904 = vmatprep.mubr.msk.f32.mxu0 %vm388_vm5, %v737_v51 }
 0x633   :  { %1905 = vmatmul.mubr.msk.f32.vlgmr.msra.gmra.mxu0 %vm388_vm5, %v1892_v50  ;;  %v1712_v50 = vld [vmem:[#allocation10] ss:$0 sm:$0xff] }
 0x63a   :  { %v1895_v52 = vpop.f32.mrf.mxu0 }
 0x63c   :  { %v747_v53 = vpop.f32.mrf.mxu0 }
 0x63d   :  { %1907 = vmatprep.mubr.msk.f32.mxu0 %vm388_vm5, %v747_v53 }
 0x63e   :  { %1908 = vmatmul.mubr.msk.f32.gmra.mxu0 %vm388_vm5, %v1895_v52 }
 0x6f3   :  { %v1906_v55 = vpop.f32.mrf.mxu0 }
 0x6f4   :  { %v851_v56 = vadd.f32 %v1906_v55, %v1706_v54 }
 0x6f5   :  { %v845_v57 = vpop.f32.mrf.mxu0 }
 0x6f6   :  { %v846_v58 = vadd.f32 %v1706_v54, %v845_v57  ;;  %v865_v59 = vadd.f32 %v851_v56, %v2682_v33 }
 0x6f8   :  { %v873_v60 = vsel %vm388_vm5, %v865_v59, 0.0  ;;  %v864_v61 = vadd.f32 %v846_v58, %v2680_v32 }
 0x6f9   :  { %874 = vadd.xlane.f32.xlu1 %v873_v60 }
 0x6fa   :  { %v870_v62 = vsel %vm388_vm5, %v864_v61, 0.0 }
 0x6fb   :  { %871 = vadd.xlane.f32.xlu0 %v870_v62  ;;  %v1102_v62 = vld [vmem:[%s2983_s13 + $0x78] sm:$0xff] }
 0x6fc   :  { %1924 = vmatprep.subr.mxu0 %v1102_v62 }
 0x6fd   :  { %1925 = vmatpush3.msra.mxu0 %v1102_v62 }
 0x6fe   :  { %v1909_v63 = vpop.f32.mrf.mxu0 }
 0x6ff   :  { %v861_v1 = vadd.f32 %v1909_v63, %v1706_v54  ;;  %v1101_v63 = vld [vmem:[%s2983_s13 + $0x70] sm:$0xff] }
 0x700   :  { %v855_v0 = vpop.f32.mrf.mxu0  ;;  %1926 = vmatprep.subr.mxu0 %v1101_v63 }
 0x701   :  { %v856_v2 = vadd.f32 %v1706_v54, %v855_v0  ;;  %v867_v5 = vadd.f32 %v861_v1, %v2696_v39  ;;  %1927 = vmatpush3.msra.mxu0 %v1101_v63  ;;  %v1100_v0 = vld [vmem:[%s2983_s13 + $0x68] sm:$0xff]  ;;  %v1099_v1 = vld [vmem:[%s2983_s13 + $0x60] sm:$0xff] }
 0x702   :  { %1928 = vmatprep.subr.mxu0 %v1100_v0 }
 0x703   :  { %v866_v3 = vadd.f32 %v856_v2, %v2694_v38  ;;  %v879_v33 = vsel %vm388_vm5, %v867_v5, 0.0  ;;  %1929 = vmatpush3.msra.mxu0 %v1100_v0  ;;  %v1098_v2 = vld [vmem:[%s2983_s13 + $0x58] sm:$0xff] }
 0x704   :  { %1930 = vmatprep.subr.mxu0 %v1099_v1 }
 0x705   :  { %v876_v4 = vsel %vm388_vm5, %v866_v3, 0.0  ;;  %1931 = vmatpush3.msra.mxu0 %v1099_v1  ;;  %v1718_v1 = vld [vmem:[#allocation14] ss:$0 sm:$0xff] }
 0x706   :  { %877 = vadd.xlane.f32.xlu0 %v876_v4  ;;  %1932 = vmatprep.subr.mxu0 %v1098_v2  ;;  %v1096_v4 = vld [vmem:[%s2983_s13 + $0x48] sm:$0xff] }
 0x707   :  { %1933 = vmatpush3.msra.mxu0 %v1098_v2 }
 0x70a   :  { %880 = vadd.xlane.f32.xlu0 %v879_v33  ;;  %v1094_v33 = vld [vmem:[%s2983_s13 + $0x38] sm:$0xff] }
 0x782   :  { %v875_v6 = vpop.xlane.xlu1 %874 }
 0x783   :  { %v884_v32 = vmul.f32 0.03125, %v875_v6  ;;  %v1093_v6 = vld [vmem:[%s2983_s13 + $0x30] sm:$0xff] }
 0x784   :  { %v872_v7 = vpop.xlane.xlu0 %871 }
 0x785   :  { %v888_v8 = vsub.f32 %v865_v59, %v884_v32  ;;  %v883_v9 = vmul.f32 0.03125, %v872_v7  ;;  %v1092_v32 = vld [vmem:[%s2983_s13 + $0x28] sm:$0xff]  ;;  %v1091_v7 = vld [vmem:[%s2983_s13 + $0x20] sm:$0xff] }
 0x787   :  { %v887_v10 = vsub.f32 %v864_v61, %v883_v9  ;;  %v892_v11 = vmul.f32 %v888_v8, %v888_v8  ;;  %v1089_v9 = vld [vmem:[%s2983_s13 + $0x10] sm:$0xff] }
 0x789   :  { %v898_v12 = vsel %vm388_vm5, %v892_v11, 0.0  ;;  %v891_v13 = vmul.f32 %v887_v10, %v887_v10  ;;  %v1087_v11 = vld [vmem:[%s2983_s13] sm:$0xff] }
 0x78a   :  { %899 = vadd.xlane.f32.xlu0 %v898_v12  ;;  %v1713_v12 = vld [vmem:[#allocation13] ss:$0 sm:$0xff] }
 0x78b   :  { %v895_v38 = vsel %vm388_vm5, %v891_v13, 0.0 }
 0x78c   :  { %896 = vadd.xlane.f32.xlu1 %v895_v38 }
 0x78f   :  { %v878_v14 = vpop.xlane.xlu0 %877 }
 0x790   :  { %v885_v39 = vmul.f32 0.03125, %v878_v14 }
 0x792   :  { %v889_v15 = vsub.f32 %v866_v3, %v885_v39  ;;  %v1097_v3 = vld [vmem:[%s2983_s13 + $0x50] sm:$0xff] }
 0x793   :  { %v881_v16 = vpop.xlane.xlu0 %880  ;;  %1934 = vmatprep.subr.mxu0 %v1097_v3 }
 0x794   :  { %v886_v17 = vmul.f32 0.03125, %v881_v16  ;;  %v893_v19 = vmul.f32 %v889_v15, %v889_v15  ;;  %1935 = vmatpush3.msra.mxu0 %v1097_v3 }
 0x795   :  { %1936 = vmatprep.subr.mxu0 %v1096_v4 }
 0x796   :  { %v890_v20 = vsub.f32 %v867_v5, %v886_v17  ;;  %v901_v21 = vsel %vm388_vm5, %v893_v19, 0.0  ;;  %1937 = vmatpush3.msra.mxu0 %v1096_v4  ;;  %v1095_v5 = vld [vmem:[%s2983_s13 + $0x40] sm:$0xff] }
 0x797   :  { %902 = vadd.xlane.f32.xlu1 %v901_v21  ;;  %1938 = vmatprep.subr.mxu0 %v1095_v5 }
 0x798   :  { %v894_v22 = vmul.f32 %v890_v20, %v890_v20  ;;  %1939 = vmatpush3.msra.mxu0 %v1095_v5 }
 0x799   :  { %1940 = vmatprep.subr.mxu0 %v1094_v33 }
 0x79a   :  { %v904_v23 = vsel %vm388_vm5, %v894_v22, 0.0  ;;  %1941 = vmatpush3.msra.mxu0 %v1094_v33 }
 0x79b   :  { %905 = vadd.xlane.f32.xlu0 %v904_v23  ;;  %1942 = vmatprep.subr.mxu0 %v1093_v6 }
 0x79c   :  { %1943 = vmatpush3.msra.mxu0 %v1093_v6 }
 0x79d   :  { %1944 = vmatprep.subr.mxu0 %v1092_v32 }
 0x79e   :  { %1945 = vmatpush3.msra.mxu0 %v1092_v32 }
 0x79f   :  { %1946 = vmatprep.subr.mxu0 %v1091_v7 }
 0x7a0   :  { %1947 = vmatpush3.msra.mxu0 %v1091_v7 }
 0x813   :  { %v900_v28 = vpop.xlane.xlu0 %899 }
 0x814   :  { %v908_v29 = vmul.f32 0.03125, %v900_v28 }
 0x815   :  { %v897_v30 = vpop.xlane.xlu1 %896 }
 0x816   :  { %v912_v31 = vadd.f32 1e-12, %v908_v29  ;;  %v907_v34 = vmul.f32 0.03125, %v897_v30 }
 0x818   :  { %2070 = vrsqrt.f32 %v912_v31  ;;  %v911_v35 = vadd.f32 1e-12, %v907_v34 }
 0x81a   :  { %2072 = vrsqrt.f32 %v911_v35 }
 0x820   :  { %v903_v36 = vpop.xlane.xlu1 %902 }
 0x821   :  { %v909_v37 = vmul.f32 0.03125, %v903_v36 }
 0x823   :  { %v913_v40 = vadd.f32 1e-12, %v909_v37 }
 0x824   :  { %v906_v41 = vpop.xlane.xlu0 %905 }
 0x825   :  { %v2071_v42 = vpop.eup %2070  ;;  %2074 = vrsqrt.f32 %v913_v40  ;;  %v910_v43 = vmul.f32 0.03125, %v906_v41 }
 0x826   :  { %v920_v44 = vmul.f32 %v2071_v42, %v888_v8  ;;  %v1090_v8 = vld [vmem:[%s2983_s13 + $0x18] sm:$0xff] }
 0x827   :  { %v2073_v46 = vpop.eup %2072  ;;  %v914_v47 = vadd.f32 1e-12, %v910_v43  ;;  %1948 = vmatprep.subr.mxu0 %v1090_v8 }
 0x828   :  { %v919_v48 = vmul.f32 %v2073_v46, %v887_v10  ;;  %v930_v49 = vmul.f32 %v1711_v45, %v920_v44  ;;  %1949 = vmatpush3.msra.mxu0 %v1090_v8  ;;  %v1088_v10 = vld [vmem:[%s2983_s13 + $0x8] sm:$0xff] }
 0x829   :  { %2076 = vrsqrt.f32 %v914_v47  ;;  %1950 = vmatprep.subr.mxu0 %v1089_v9 }
 0x82a   :  { %v929_v51 = vmul.f32 %v1711_v45, %v919_v48  ;;  %v2779_v53 = vadd.f32 %v1712_v50, %v930_v49  ;;  %1951 = vmatpush3.msra.mxu0 %v1089_v9 }
 0x82b   :  { %1952 = vmatprep.subr.mxu0 %v1088_v10 }
 0x82c   :  { %v2777_v52 = vadd.f32 %v1712_v50, %v929_v51  ;;  %1953 = vmatpush3.msra.mxu0 %v1088_v10 }
 0x82d   :  { %1954 = vmatprep.subr.mxu0 %v1087_v11 }
 0x82e   :  { %1918 = vmatprep.mubr.msk.f32.mxu1 %vm388_vm5, %v2777_v52  ;;  %1955 = vmatpush3.msra.mxu0 %v1087_v11 }
 0x82f   :  { %1919 = vmatmul.mubr.msk.f32.vlgmr.msra.gmra.mxu1 %vm388_vm5, %v2779_v53 }
 0x832   :  { %v2075_v54 = vpop.eup %2074 }
 0x833   :  { %v921_v55 = vmul.f32 %v2075_v54, %v889_v15 }
 0x835   :  { %v931_v56 = vmul.f32 %v1711_v45, %v921_v55 }
 0x836   :  { %v2077_v57 = vpop.eup %2076 }
 0x837   :  { %v2785_v58 = vadd.f32 %v1712_v50, %v931_v56  ;;  %v922_v59 = vmul.f32 %v2077_v57, %v890_v20 }
 0x839   :  { %1921 = vmatprep.mubr.msk.f32.mxu1 %vm388_vm5, %v2785_v58  ;;  %v932_v60 = vmul.f32 %v1711_v45, %v922_v59 }
 0x83b   :  { %v2789_v61 = vadd.f32 %v1712_v50, %v932_v60 }
 0x83d   :  { %1922 = vmatmul.mubr.msk.f32.gmra.mxu1 %vm388_vm5, %v2789_v61 }
 0x83e   :  { %1970 = vmatprep.mubr.msk.f32.mxu1 %vm2437_vm6, %v2434_v18 }
 0x8ef   :  { %v1920_v13 = vpop.f32.mrf.mxu1 }
 0x8f0   :  { %v1038_v38 = vadd.f32 %v1920_v13, %v1713_v12 }
 0x8f1   :  { %v1032_v14 = vpop.f32.mrf.mxu1 }
 0x8f2   :  { %v1052_v39 = vmul.f32 %v1038_v38, %v1038_v38  ;;  %v1033_v15 = vadd.f32 %v1713_v12, %v1032_v14 }
 0x8f4   :  { %v1056_v16 = vmul.f32 %v1052_v39, %v1038_v38  ;;  %v1051_v17 = vmul.f32 %v1033_v15, %v1033_v15 }
 0x8f6   :  { %v1060_v19 = vmul.f32 0.044715, %v1056_v16  ;;  %v1055_v20 = vmul.f32 %v1051_v17, %v1033_v15 }
 0x8f8   :  { %v1064_v21 = vadd.f32 %v1060_v19, %v1038_v38  ;;  %v1059_v22 = vmul.f32 0.044715, %v1055_v20 }
 0x8fa   :  { %v1068_v23 = vmul.f32 0.7978846, %v1064_v21  ;;  %v1063_v24 = vadd.f32 %v1059_v22, %v1033_v15 }
 0x8fc   :  { %2078 = vtanh.f32 %v1068_v23  ;;  %v1067_v25 = vmul.f32 0.7978846, %v1063_v24 }
 0x8fd   :  { %v1923_v26 = vpop.f32.mrf.mxu1 }
 0x8fe   :  { %2080 = vtanh.f32 %v1067_v25  ;;  %v1048_v27 = vadd.f32 %v1923_v26, %v1713_v12 }
 0x8ff   :  { %v1042_v28 = vpop.f32.mrf.mxu1 }
 0x900   :  { %v1054_v29 = vmul.f32 %v1048_v27, %v1048_v27  ;;  %v1043_v30 = vadd.f32 %v1713_v12, %v1042_v28 }
 0x902   :  { %v1058_v31 = vmul.f32 %v1054_v29, %v1048_v27  ;;  %v1053_v34 = vmul.f32 %v1043_v30, %v1043_v30 }
 0x904   :  { %v1062_v35 = vmul.f32 0.044715, %v1058_v31  ;;  %v1057_v36 = vmul.f32 %v1053_v34, %v1043_v30 }
 0x906   :  { %v1066_v37 = vadd.f32 %v1062_v35, %v1048_v27  ;;  %v1061_v40 = vmul.f32 0.044715, %v1057_v36 }
 0x908   :  { %v1070_v41 = vmul.f32 0.7978846, %v1066_v37  ;;  %v1065_v42 = vadd.f32 %v1061_v40, %v1043_v30 }
 0x909   :  { %v2079_v43 = vpop.eup %2078 }
 0x90a   :  { %v1076_v44 = vadd.f32 1.0, %v2079_v43  ;;  %2082 = vtanh.f32 %v1070_v41  ;;  %v1069_v45 = vmul.f32 0.7978846, %v1065_v42 }
 0x90b   :  { %v2081_v46 = vpop.eup %2080 }
 0x90c   :  { %2084 = vtanh.f32 %v1069_v45  ;;  %v1075_v47 = vadd.f32 1.0, %v2081_v46  ;;  %v1080_v48 = vmul.f32 0.5, %v1076_v44 }
 0x90e   :  { %v1079_v49 = vmul.f32 0.5, %v1075_v47  ;;  %v1084_v51 = vmul.f32 %v1080_v48, %v1038_v38  ;;  %v1719_v47 = vld [vmem:[#allocation16] ss:$0 sm:$0xff] }
 0x910   :  { %v1083_v50 = vmul.f32 %v1079_v49, %v1033_v15 }
 0x912   :  { %1956 = vmatprep.mubr.f32.mxu0 %v1083_v50  ;;  %v1720_v50 = vld [vmem:[#allocation17] ss:$0 sm:$0xff] }
 0x913   :  { %1957 = vmatmul.mubr.f32.vlgmr.msra.gmra.mxu0 %v1084_v51 }
 0x917   :  { %v2083_v54 = vpop.eup %2082 }
 0x918   :  { %v1078_v55 = vadd.f32 1.0, %v2083_v54 }
 0x919   :  { %v2085_v56 = vpop.eup %2084 }
 0x91a   :  { %v1077_v57 = vadd.f32 1.0, %v2085_v56  ;;  %v1082_v59 = vmul.f32 0.5, %v1078_v55 }
 0x91c   :  { %v1081_v60 = vmul.f32 0.5, %v1077_v57  ;;  %v1086_v63 = vmul.f32 %v1082_v59, %v1048_v27 }
 0x91e   :  { %v1085_v62 = vmul.f32 %v1081_v60, %v1043_v30 }
 0x920   :  { %1959 = vmatprep.mubr.f32.mxu0 %v1085_v62 }
 0x921   :  { %1960 = vmatmul.mubr.f32.gmra.mxu0 %v1086_v63 }
 0x9d3   :  { %v1958_v0 = vpop.f32.mrf.mxu0 }
 0x9d4   :  { %v1182_v4 = vadd.f32 %v1958_v0, %v1718_v1 }
 0x9d5   :  { %v1176_v2 = vpop.f32.mrf.mxu0 }
 0x9d6   :  { %v1177_v6 = vadd.f32 %v1718_v1, %v1176_v2  ;;  %v1196_v10 = vadd.f32 %v1182_v4, %v2779_v53  ;;  %v1273_v4 = vld [vmem:[#allocation2] sm:$0xff] }
 0x9d8   :  { %v1195_v12 = vadd.f32 %v1177_v6, %v2777_v52  ;;  %v1204_v13 = vsel %vm388_vm5, %v1196_v10, 0.0  ;;  %v1348_v6 = vld [vmem:[#allocation19 + $0x8] sm:$0xff] }
 0x9da   :  { %v1201_v38 = vsel %vm388_vm5, %v1195_v12, 0.0 }
 0x9e1   :  { %v1961_v3 = vpop.f32.mrf.mxu0 }
 0x9e2   :  { %v1192_v5 = vadd.f32 %v1961_v3, %v1718_v1 }
 0x9e3   :  { %v1186_v33 = vpop.f32.mrf.mxu0 }
 0x9e4   :  { %v1187_v32 = vadd.f32 %v1718_v1, %v1186_v33  ;;  %v1198_v7 = vadd.f32 %v1192_v5, %v2789_v61  ;;  %v1350_v5 = vld [vmem:[#allocation19 + $0x18] sm:$0xff]  ;;  %v1349_v33 = vld [vmem:[#allocation19 + $0x10] sm:$0xff] }
 0x9e6   :  { %v1210_v8 = vsel %vm388_vm5, %v1198_v7, 0.0  ;;  %v1197_v9 = vadd.f32 %v1187_v32, %v2785_v58  ;;  %v1347_v32 = vld [vmem:[#allocation19] sm:$0xff] }
 0x9e7   :  { %1211 = vadd.xlane.f32.xlu1 %v1210_v8 }
 0x9e8   :  { %v1207_v11 = vsel %vm388_vm5, %v1197_v9, 0.0 }
 0x9e9   :  { %1208 = vadd.xlane.f32.xlu0 %v1207_v11 }
 0x9eb   :  { %1205 = vadd.xlane.f32.xlu1 %v1204_v13 }
 0x9ed   :  { %1202 = vadd.xlane.f32.xlu0 %v1201_v38 }
 0xa70   :  { %v1212_v14 = vpop.xlane.xlu1 %1211 }
 0xa71   :  { %v1216_v61 = vmul.f32 0.03125, %v1212_v14 }
 0xa72   :  { %v1209_v39 = vpop.xlane.xlu0 %1208 }
 0xa73   :  { %v1220_v15 = vsub.f32 %v1198_v7, %v1216_v61  ;;  %v1215_v16 = vmul.f32 0.03125, %v1209_v39 }
 0xa74   :  { %v1206_v58 = vpop.xlane.xlu1 %1205 }
 0xa75   :  { %v1219_v17 = vsub.f32 %v1197_v9, %v1215_v16  ;;  %v1214_v53 = vmul.f32 0.03125, %v1206_v58  ;;  %v1224_v19 = vmul.f32 %v1220_v15, %v1220_v15  ;;  %v1722_v9 = vld [vmem:[#allocation20] ss:$0 sm:$0xff]  ;;  %v1464_v16 = vld [vmem:[%s2991_s21 + $0x18] sm:$0xff] }
 0xa76   :  { %v1203_v20 = vpop.xlane.xlu0 %1202  ;;  %v1463_v58 = vld [vmem:[%s2991_s21 + $0x10] sm:$0xff] }
 0xa77   :  { %v1218_v21 = vsub.f32 %v1196_v10, %v1214_v53  ;;  %v1213_v22 = vmul.f32 0.03125, %v1203_v20  ;;  %v1234_v52 = vsel %vm388_vm5, %v1224_v19, 0.0  ;;  %v1223_v23 = vmul.f32 %v1219_v17, %v1219_v17  ;;  %v1461_v53 = vld [vmem:[%s2991_s21] sm:$0xff] }
 0xa78   :  { %1235 = vadd.xlane.f32.xlu1 %v1234_v52  ;;  %v1724_v52 = vld [vmem:[#allocation22] ss:$0 sm:$0xff] }
 0xa79   :  { %v1217_v24 = vsub.f32 %v1195_v12, %v1213_v22  ;;  %v1231_v25 = vsel %vm388_vm5, %v1223_v23, 0.0  ;;  %v1222_v26 = vmul.f32 %v1218_v21, %v1218_v21 }
 0xa7a   :  { %1232 = vadd.xlane.f32.xlu0 %v1231_v25 }
 0xa7b   :  { %v1228_v27 = vsel %vm388_vm5, %v1222_v26, 0.0  ;;  %v1221_v28 = vmul.f32 %v1217_v24, %v1217_v24 }
 0xa7c   :  { %1229 = vadd.xlane.f32.xlu1 %v1228_v27 }
 0xa7d   :  { %v1225_v29 = vsel %vm388_vm5, %v1221_v28, 0.0  ;;  %v1726_v28 = vld [vmem:[%s2992_s22] ss:$0 sm:$0xff] }
 0xa7e   :  { %1226 = vadd.xlane.f32.xlu0 %v1225_v29 }
 0xb01   :  { %v1236_v30 = vpop.xlane.xlu1 %1235 }
 0xb02   :  { %v1240_v31 = vmul.f32 0.03125, %v1236_v30 }
 0xb03   :  { %v1233_v34 = vpop.xlane.xlu0 %1232 }
 0xb04   :  { %v1244_v35 = vadd.f32 1e-12, %v1240_v31  ;;  %v1239_v36 = vmul.f32 0.03125, %v1233_v34 }
 0xb05   :  { %v1230_v37 = vpop.xlane.xlu1 %1229 }
 0xb06   :  { %2086 = vrsqrt.f32 %v1244_v35  ;;  %v1243_v40 = vadd.f32 1e-12, %v1239_v36  ;;  %v1238_v41 = vmul.f32 0.03125, %v1230_v37  ;;  %v1574_v35 = vld [vmem:[%s2993_s23 + $0x78] sm:$0xff]  ;;  %v1573_v36 = vld [vmem:[%s2993_s23 + $0x70] sm:$0xff]  ;;  %v1572_v37 = vld [vmem:[%s2993_s23 + $0x68] sm:$0xff] }
 0xb07   :  { %v1227_v42 = vpop.xlane.xlu0 %1226 }
 0xb08   :  { %2088 = vrsqrt.f32 %v1243_v40  ;;  %v1242_v43 = vadd.f32 1e-12, %v1238_v41  ;;  %v1237_v44 = vmul.f32 0.03125, %v1227_v42  ;;  %v1571_v40 = vld [vmem:[%s2993_s23 + $0x60] sm:$0xff]  ;;  %v1570_v41 = vld [vmem:[%s2993_s23 + $0x58] sm:$0xff]  ;;  %v1569_v42 = vld [vmem:[%s2993_s23 + $0x50] sm:$0xff] }
 0xb0a   :  { %2090 = vrsqrt.f32 %v1242_v43  ;;  %v1241_v45 = vadd.f32 1e-12, %v1237_v44  ;;  %v1568_v43 = vld [vmem:[%s2993_s23 + $0x48] sm:$0xff]  ;;  %v1567_v44 = vld [vmem:[%s2993_s23 + $0x40] sm:$0xff] }
 0xb0c   :  { %2092 = vrsqrt.f32 %v1241_v45  ;;  %v1566_v45 = vld [vmem:[%s2993_s23 + $0x38] sm:$0xff] }
 0xb13   :  { %v2087_v46 = vpop.eup %2086 }
 0xb14   :  { %v1252_v48 = vmul.f32 %v2087_v46, %v1220_v15  ;;  %v1565_v46 = vld [vmem:[%s2993_s23 + $0x30] sm:$0xff] }
 0xb15   :  { %v2089_v49 = vpop.eup %2088 }
 0xb16   :  { %v1262_v51 = vmul.f32 %v1719_v47, %v1252_v48  ;;  %v1251_v54 = vmul.f32 %v2089_v49, %v1219_v17  ;;  %v1462_v17 = vld [vmem:[%s2991_s21 + $0x8] sm:$0xff]  ;;  %v1563_v48 = vld [vmem:[%s2993_s23 + $0x20] sm:$0xff]  ;;  %v1562_v49 = vld [vmem:[%s2993_s23 + $0x18] sm:$0xff] }
 0xb17   :  { %v2091_v55 = vpop.eup %2090 }
 0xb18   :  { %v1272_v56 = vadd.f32 %v1720_v50, %v1262_v51  ;;  %v1261_v57 = vmul.f32 %v1719_v47, %v1251_v54  ;;  %v1250_v59 = vmul.f32 %v2091_v55, %v1218_v21  ;;  %v1560_v51 = vld [vmem:[%s2993_s23 + $0x8] sm:$0xff]  ;;  %v1559_v54 = vld [vmem:[%s2993_s23] sm:$0xff] }
 0xb19   :  { %v2093_v60 = vpop.eup %2092 }
 0xb1a   :  { %1963 = vmatpush3.msra.mxu1 %v1272_v56  ;;  %v1271_v62 = vadd.f32 %v1720_v50, %v1261_v57  ;;  %v1260_v63 = vmul.f32 %v1719_v47, %v1250_v59  ;;  %v1249_v0 = vmul.f32 %v2093_v60, %v1217_v24  ;;  %v1725_v24 = vld [vmem:[%s2990_s20] ss:$0 sm:$0xff] }
 0xb1b   :  { %1964 = vmatprep.subr.mxu1 %v2434_v18 }
 0xb1c   :  { %1965 = vmatpush3.msra.mxu1 %v1271_v62  ;;  %v1270_v1 = vadd.f32 %v1720_v50, %v1260_v63  ;;  %v1259_v2 = vmul.f32 %v1719_v47, %v1249_v0  ;;  %v1564_v47 = vld [vmem:[%s2993_s23 + $0x28] sm:$0xff] }
 0xb1d   :  { %1966 = vmatprep.subr.mxu1 %v2434_v18 }
 0xb1e   :  { %1967 = vmatpush3.msra.mxu1 %v1270_v1  ;;  %v1269_v3 = vadd.f32 %v1720_v50, %v1259_v2  ;;  %v1561_v50 = vld [vmem:[%s2993_s23 + $0x10] sm:$0xff]  ;;  %s2438_s23 = smov [#allocation23]  }
 0xb1f   :  { %1968 = vmatprep.subr.mxu1 %v2434_v18  ;;  %s1652_s22 = sshll.u32 %s2438_s23, 4  ;;  %s1653_s22 = int_to_ptr.vmem [resolvable:$true] %s1652_s22 }
 0xb20   :  { %1969 = vmatpush3.msra.mxu1 %v1269_v3  ;;  %s2360_s28 = scalar_lea.vmem %s1653_s22, 128  ;;  %p2365_p10 = scmp.lt.s32.totalorder %s1653_s22, %s1653_s22 }
 0xb21   :  { %1971 = vmatmul.mubr.msk.f32.vlgmr.msra.gmra.mxu1 %vm388_vm5, %v1273_v4  ;;  %1973 = vmatprep.subr.mxu1 %v2434_v18  ;;  %p2361_p9 = scmp.ne.s32.totalorder %s1653_s22, %s2360_s28  ;;  %p2366_p11 = scmp.lt.s32.totalorder %s2360_s28, %s2360_s28 }
 0xb22   :  { %1974 = vmatpush3.msra.mxu1 %v1350_v5  ;;  %1981 = vmatprep.mubr.msk.f32.mxu1 %vm2437_vm6, %v2434_v18 }
 0xb23   :  { %1975 = vmatprep.subr.mxu1 %v2434_v18  ;;  %p2367_p12 = por %p2366_p11, %p2365_p10 }
 0xb24   :  { %1976 = vmatpush3.msra.mxu1 %v1349_v33 }
 0xb25   :  { %1977 = vmatprep.subr.mxu1 %v2434_v18  ;;  %p2368_p13 = pnand %p2367_p12, %p2361_p9 }
 0xb26   :  { %1978 = vmatpush3.msra.mxu1 %v1348_v6 }
 0xb27   :  { %1979 = vmatprep.subr.mxu1 %v2434_v18 }
 0xb28   :  { %1980 = vmatpush3.msra.mxu1 %v1347_v32 }
 0xb29   :  { %1984 = vmatprep.subr.mxu1 %v2434_v18 }
 0xbe1   :  { %v1343_v7 = vpop.f32.mrf.mxu1 }
 0xbe2   :  { %1982 = vmatmul.mubr.msk.f32.vlgmr.msra.gmra.mxu1 %vm388_vm5, %v1343_v7 }
 0xbe3   :  { %v1972_v8 = vpop.f32.mrf.mxu1  ;;  %1992 = vmatprep.mubr.msk.f32.mxu1 %vm2437_vm6, %v2434_v18  ;;  %1985 = vmatpush3.msra.mxu1 %v1464_v16 }
 0xbe4   :  { %1986 = vmatprep.subr.mxu1 %v2434_v18 }
 0xbe5   :  { %1987 = vmatpush3.msra.mxu1 %v1463_v58 }
 0xbe6   :  { %1988 = vmatprep.subr.mxu1 %v2434_v18 }
 0xbe7   :  { %1989 = vmatpush3.msra.mxu1 %v1462_v17 }
 0xbe8   :  { %1990 = vmatprep.subr.mxu1 %v2434_v18 }
 0xbe9   :  { %1991 = vmatpush3.msra.mxu1 %v1461_v53 }
 0xbea   :  { %1995 = vmatprep.subr.mxu1 %v2434_v18 }
 0xca2   :  { %v1427_v10 = vpop.f32.mrf.mxu1 }
 0xca3   :  { %v1428_v11 = vadd.f32 %v1722_v9, %v1427_v10 }
 0xca4   :  { %v1983_v12 = vpop.f32.mrf.mxu1 }
 0xca5   :  { %v1433_v13 = vsel %vm388_vm5, %v1428_v11, 0.0 }
 0xca6   :  { %1434 = vadd.xlane.f32.xlu1 %v1433_v13 }
 0xd2f   :  { %v1435_v38 = vpop.xlane.xlu1 %1434 }
 0xd30   :  { %v1436_v14 = vmul.f32 0.03125, %v1435_v38 }
 0xd32   :  { %v1437_v61 = vsub.f32 %v1428_v11, %v1436_v14 }
 0xd34   :  { %v1438_v39 = vmul.f32 %v1437_v61, %v1437_v61 }
 0xd36   :  { %v1439_v15 = vsel %vm388_vm5, %v1438_v39, 0.0 }
 0xd37   :  { %1440 = vadd.xlane.f32.xlu0 %v1439_v15 }
 0xdc0   :  { %v1441_v19 = vpop.xlane.xlu0 %1440 }
 0xdc1   :  { %v1442_v20 = vmul.f32 0.03125, %v1441_v19 }
 0xdc3   :  { %v1443_v21 = vadd.f32 1e-05, %v1442_v20 }
 0xdc5   :  { %2094 = vrsqrt.f32 %v1443_v21 }
 0xdd2   :  { %v2095_v22 = vpop.eup %2094 }
 0xdd3   :  { %v1445_v23 = vmul.f32 %v2095_v22, %v1437_v61 }
 0xdd5   :  { %v1452_v25 = vmul.f32 %v1724_v52, %v1445_v23 }
 0xdd7   :  { %v1459_v26 = vadd.f32 %v1725_v24, %v1452_v25 }
 0xdd9   :  { %v1460_v27 = vmax.f32 %v1459_v26, 0.0 }
 0xddb   :  { %1993 = vmatmul.mubr.msk.f32.vlgmr.msra.gmra.mxu1 %vm388_vm5, %v1460_v27 }
 0xddc   :  { %2027 = vmatprep.mubr.msk.f32.mxu1 %vm2437_vm6, %v2434_v18  ;;  %1996 = vmatpush3.msra.mxu1 %v1574_v35 }
 0xddd   :  { %1997 = vmatprep.subr.mxu1 %v2434_v18 }
 0xdde   :  { %1998 = vmatpush3.msra.mxu1 %v1573_v36 }
 0xddf   :  { %1999 = vmatprep.subr.mxu1 %v2434_v18 }
 0xde0   :  { %2000 = vmatpush3.msra.mxu1 %v1572_v37 }
 0xde1   :  { %2001 = vmatprep.subr.mxu1 %v2434_v18 }
 0xde2   :  { %2002 = vmatpush3.msra.mxu1 %v1571_v40 }
 0xde3   :  { %2003 = vmatprep.subr.mxu1 %v2434_v18 }
 0xde4   :  { %2004 = vmatpush3.msra.mxu1 %v1570_v41 }
 0xde5   :  { %2005 = vmatprep.subr.mxu1 %v2434_v18 }
 0xde6   :  { %2006 = vmatpush3.msra.mxu1 %v1569_v42 }
 0xde7   :  { %2007 = vmatprep.subr.mxu1 %v2434_v18 }
 0xde8   :  { %2008 = vmatpush3.msra.mxu1 %v1568_v43 }
 0xde9   :  { %2009 = vmatprep.subr.mxu1 %v2434_v18 }
 0xdea   :  { %2010 = vmatpush3.msra.mxu1 %v1567_v44 }
 0xdeb   :  { %2011 = vmatprep.subr.mxu1 %v2434_v18 }
 0xdec   :  { %2012 = vmatpush3.msra.mxu1 %v1566_v45 }
 0xded   :  { %2013 = vmatprep.subr.mxu1 %v2434_v18 }
 0xdee   :  { %2014 = vmatpush3.msra.mxu1 %v1565_v46 }
 0xdef   :  { %2015 = vmatprep.subr.mxu1 %v2434_v18 }
 0xdf0   :  { %2016 = vmatpush3.msra.mxu1 %v1564_v47 }
 0xdf1   :  { %2017 = vmatprep.subr.mxu1 %v2434_v18 }
 0xdf2   :  { %2018 = vmatpush3.msra.mxu1 %v1563_v48 }
 0xdf3   :  { %2019 = vmatprep.subr.mxu1 %v2434_v18 }
 0xdf4   :  { %2020 = vmatpush3.msra.mxu1 %v1562_v49 }
 0xdf5   :  { %2021 = vmatprep.subr.mxu1 %v2434_v18 }
 0xdf6   :  { %2022 = vmatpush3.msra.mxu1 %v1561_v50 }
 0xdf7   :  { %2023 = vmatprep.subr.mxu1 %v2434_v18 }
 0xdf8   :  { %2024 = vmatpush3.msra.mxu1 %v1560_v51 }
 0xdf9   :  { %2025 = vmatprep.subr.mxu1 %v2434_v18 }
 0xdfa   :  { %2026 = vmatpush3.msra.mxu1 %v1559_v54 }
 0xe9b   :  { %v1541_v29 = vpop.f32.mrf.mxu1 }
 0xe9c   :  { %v2896_v30 = vadd.f32 %v1726_v28, %v1541_v29 }
 0xe9d   :  { %v1994_v31 = vpop.f32.mrf.mxu1 }
 0xe9e   :  { %v1545_v34 = vmul.f32 %v2896_v30, %v2896_v30 }
 0xea0   :  { %1546 = vadd.xlane.f32.xlu1 %v1545_v34 }
 0xf29   :  { %v1547_v55 = vpop.xlane.xlu1 %1546 }
 0xf2a   :  { %2096 = vrsqrt.f32 %v1547_v55  ;;  %vm1550_vm7 = vcmp.eq.f32.partialorder %v1547_v55, inf  ;;  %v1553_v59 = vand.u32 2147483648, %v1547_v55  ;;  %vm1552_vm8 = vcmp.eq.f32.partialorder %v1547_v55, 0.0 }
 0xf37   :  { %v2097_v56 = vpop.eup %2096 }
 0xf38   :  { %v1549_v57 = vmul.f32 %v2097_v56, %v1547_v55 }
 0xf3a   :  { %v1551_v60 = vsel %vm1550_vm7, %v1547_v55, %v1549_v57 }
 0xf3b   :  { %v1554_v62 = vsel %vm1552_vm8, %v1553_v59, %v1551_v60 }
 0xf3c   :  { %v1555_v63 = vmax.f32 %v1554_v62, 1e-12 }
 0xf3e   :  { %2098 = vrcp.f32 %v1555_v63 }
 0xf4b   :  { %v2099_v0 = vpop.eup %2098 }
 0xf4c   :  { %v1557_v1 = vmul.f32 %v2099_v0, %v2896_v30 }
 0xf4e   :  { %2028 = vmatmul.mubr.f32.vlgmr.msra.gmra.mxu1 %v1557_v1  ;;  %1558 = vst [vmem:[#allocation23] sm:$0xff] %v1557_v1 }
 0xf4f   :  { %2371 = shalt.err (!%p2368_p13)
}
 0xf50   :  { %1655 = dma.vmem_to_hbm [thread:$0]  %s1653_s22, 128, %s2994_s24, [#allocation4]  }
 0xf51   :  { %s2439_s10 = smov [#allocation24]  }
 0xf52   :  { %s1662_s3 = sshll.u32 %s2439_s10, 4  ;;  %s1663_s3 = int_to_ptr.vmem [resolvable:$true] %s1662_s3 }
 0xf53   :  { %s2380_s26 = scalar_lea.vmem %s1663_s3, 128  ;;  %p2385_p1 = scmp.lt.s32.totalorder %s1663_s3, %s1663_s3 }
 0xf54   :  { %p2381_p0 = scmp.ne.s32.totalorder %s1663_s3, %s2380_s26  ;;  %p2386_p2 = scmp.lt.s32.totalorder %s2380_s26, %s2380_s26 }
 0xf56   :  { %p2387_p3 = por %p2386_p2, %p2385_p1 }
 0xf58   :  { %p2388_p4 = pnand %p2387_p3, %p2381_p0 }
0x100e   :  { %v1641_v18 = vpop.f32.mrf.mxu1 }
0x100f   :  { %1645 = vst [vmem:[#allocation24] sm:$0xff] %v1641_v18 }
0x1010   :  { %v2029_v2 = vpop.f32.mrf.mxu1 }
0x1011   :  { %2391 = shalt.err (!%p2388_p4)
}
0x1012   :  { %1665 = dma.vmem_to_hbm [thread:$0]  %s1663_s3, 128, %s2995_s25, [#allocation25]  }
0x1013   :  { %2414 = dma.done.wait [#allocation4], 128  }
0x1014   :  { %2415 = vsyncadd [#allocation4], 4294967168 }
0x1015   :  { %2416 = dma.done.wait [#allocation25], 128  }
0x1016   :  { %2417 = vsyncadd [#allocation25], 4294967168 }
0x1017   :  { %1672 = vsyncpa [#allocation3], 1 }
0x1018   :  { %1673 = vsyncpa [#allocation6], 1 }
0x1019   :  { %1674 = vsyncpa [#allocation9], 1 }
0x101a   :  { %1675 = vsyncpa [#allocation12], 1 }
0x101b   :  { %1676 = vsyncpa [#allocation15], 1 }
0x101c   :  { %1677 = vsyncpa [#allocation18], 1 }
0x101d   :  { %1678 = vsyncpa [#allocation21], 1 }
0x101e   :  { %1679 = vsyncpa [#allocation4], 1 }
0x101f   :  { %1680 = vsyncpa [#allocation25], 1 }

</bundles_post_ra>
